<compile_context>
chip_gen: v6e
topology: v6e:2x2x1
jax: 0.10.0
libtpu: 0.0.40
codegen_flags: <defaults>
</compile_context>

<pallas_src>
import functools

import numpy as np

import jax
import jax.numpy as jnp
from jax.experimental import pallas as pl
from jax.experimental.pallas import tpu as pltpu

EPS = 1e-5       # PyTorch nn.LayerNorm default
LANE = 128       # TPU lane width
SUBLANE = 8      # TPU sublane width


def _round_up(x, m):
    return ((x + m - 1) // m) * m


# -----------------------------------------------------------------------------
# Kernel
# -----------------------------------------------------------------------------
def _layernorm(x, n_true):
    """LayerNorm without affine (affine is folded into the next Linear outside).

    Two-pass, numerically stable: mu = sum/n_true, var = sum((x-mu)^2 masked)/n_true.
    Pad lanes of x are exactly zero on entry so the full-width sum equals the true
    sum; pad lanes are masked back to zero after centering so they stay zero on exit.
    """
    n_pad = x.shape[-1]
    inv_n = 1.0 / float(n_true)
    mu = jnp.sum(x, axis=-1, keepdims=True) * inv_n
    diff = x - mu
    if n_pad != n_true:  # compile-time constant
        lane = jax.lax.broadcasted_iota(jnp.int32, x.shape, dimension=x.ndim - 1)
        diff = jnp.where(lane < n_true, diff, 0.0)
    var = jnp.sum(diff * diff, axis=-1, keepdims=True) * inv_n
    return diff * jax.lax.rsqrt(var + EPS)


def _silu(x):
    # Exact f32 SiLU.  (On v6e/v7x the sigmoid could go to the bf16 EUP / approx
    # reciprocal path for a small slot win; kept exact for tight numerical checks
    # and v5e correctness.)
    return x * jax.nn.sigmoid(x)


def noise_pred_kernel(obs_ref, fc1_w, b0_w, b1_w, fc2_w, bias_ref, out_ref,
                      *, d_true, h_true, hp, ap, matmul_dtype):
    biases = bias_ref[...]                     # (8, max(Hp, Ap)) f32, rows 0..3 used
    fc1_b = biases[0:1, :hp]
    b0_b = biases[1:2, :hp]
    b1_b = biases[2:3, :hp]
    fc2_b = biases[3:4, :ap]

    x = obs_ref[...]                           # (tb, Dp) f32

    # layer_norm1 (affine folded into fc1) -> fc1 -> SiLU
    x = _layernorm(x, d_true)
    x = jnp.dot(x.astype(matmul_dtype), fc1_w[...],
                preferred_element_type=jnp.float32) + fc1_b
    x = _silu(x)                               # (tb, Hp) f32

    # 2x MLPResNetBlock: x + SiLU(Linear(LayerNorm(x)))   (LN affine folded into W)
    for w, b in ((b0_w, b0_b), (b1_w, b1_b)):
        h = _layernorm(x, h_true)
        h = jnp.dot(h.astype(matmul_dtype), w[...],
                    preferred_element_type=jnp.float32) + b
        x = _silu(h) + x

    # layer_norm2 (affine folded into fc2) -> fc2   (lane-dense padded output)
    x = _layernorm(x, h_true)
    out_ref[...] = (jnp.dot(x.astype(matmul_dtype), fc2_w[...],
                            preferred_element_type=jnp.float32)
                    + fc2_b).astype(out_ref.dtype)


# -----------------------------------------------------------------------------
# One-time parameter preparation (hoisted off the per-call hot path)
# -----------------------------------------------------------------------------
def prepare_noise_pred_params(params, *, matmul_dtype=jnp.bfloat16):
    """Call ONCE per set of weights and cache the result.

    Folds each LayerNorm affine into the following Linear (W' = g*W, b' = b_ln@W + b),
    zero-pads all feature dims to 128 lanes, casts weights to the MXU dtype, and packs
    the four bias vectors into a single (8, max(Hp, Ap)) f32 buffer."""
    D, H = params["fc1_w"].shape
    A = params["fc2_w"].shape[1]
    Dp, Hp, Ap = _round_up(D, LANE), _round_up(H, LANE), _round_up(A, LANE)

    def fold(g, b_ln, w, b_lin):
        g = jnp.asarray(g, jnp.float32).reshape(-1, 1)
        b_ln = jnp.asarray(b_ln, jnp.float32).reshape(1, -1)
        w = jnp.asarray(w, jnp.float32)
        b_lin = jnp.asarray(b_lin, jnp.float32).reshape(1, -1)
        return g * w, (b_ln @ w + b_lin).reshape(-1)

    fc1_w, fc1_b = fold(params["ln1_g"], params["ln1_b"], params["fc1_w"], params["fc1_b"])
    b0_w, b0_b = fold(params["b0_ln_g"], params["b0_ln_b"], params["b0_w"], params["b0_b"])
    b1_w, b1_b = fold(params["b1_ln_g"], params["b1_ln_b"], params["b1_w"], params["b1_b"])
    fc2_w, fc2_b = fold(params["ln2_g"], params["ln2_b"], params["fc2_w"], params["fc2_b"])

    def pad_w(w, r, c):
        return jnp.pad(w, ((0, r - w.shape[0]), (0, c - w.shape[1]))).astype(matmul_dtype)

    weights = (pad_w(fc1_w, Dp, Hp), pad_w(b0_w, Hp, Hp),
               pad_w(b1_w, Hp, Hp), pad_w(fc2_w, Hp, Ap))

    wb = max(Hp, Ap)
    bias_pack = jnp.zeros((SUBLANE, wb), jnp.float32)
    bias_pack = bias_pack.at[0, :H].set(fc1_b)
    bias_pack = bias_pack.at[1, :H].set(b0_b)
    bias_pack = bias_pack.at[2, :H].set(b1_b)
    bias_pack = bias_pack.at[3, :A].set(fc2_b)

    # Materialize now so nothing is re-computed on the hot path.
    weights = tuple(jax.block_until_ready(w) for w in weights)
    bias_pack = jax.block_until_ready(bias_pack)

    return {"weights": weights, "bias_pack": bias_pack,
            "dims": (D, H, A, Dp, Hp, Ap), "matmul_dtype": matmul_dtype}


# -----------------------------------------------------------------------------
# Generation-aware tile / VMEM-budget selection
# -----------------------------------------------------------------------------
def _tpu_vmem_capacity_bytes():
    try:
        return int(pltpu.get_tpu_info().vmem_capacity_bytes)
    except Exception:
        return 64 * 1024 * 1024   # conservative default (v7x per-TensorCore VMEM)


def _num_tensorcores():
    try:
        return max(1, int(getattr(jax.devices()[0], "num_cores", 1) or 1))
    except Exception:
        return 1


def _select_tile(B, Dp, Hp, Ap, const_bytes, tb=None):
    """Pick batch tile and scoped-VMEM limit from the chip's physical VMEM."""
    vmem_cap = _tpu_vmem_capacity_bytes()
    # ~112 MiB scoped limit on 128 MiB chips (v5e/v6e), ~48 MiB on 64 MiB v7x.
    vmem_limit = max(32 * 1024 * 1024, vmem_cap - 16 * 1024 * 1024)
    num_cores = _num_tensorcores()

    if tb is None:
        if num_cores > 1:
            # >= 2 grid steps per TensorCore: megacore sharding + per-core DMA pipelining.
            tb = pl.cdiv(B, 2 * num_cores)
        else:
            # Single TC: one big tile avoids per-step overhead for small B; the VMEM
            # budget below splits it for large B.
            tb = B
        tb = min(1024, tb)
    tb = max(SUBLANE, _round_up(int(tb), SUBLANE))

    def vmem_estimate(t):
        act = 2 * t * Dp * 4 + 2 * t * Ap * 4        # double-buffered obs / out tiles
        inter = 4 * t * Hp * 4                       # LN / matmul / SiLU / residual temps
        return const_bytes + act + inter + (2 << 20)  # + internal scratch headroom

    while tb > SUBLANE and vmem_estimate(tb) > vmem_limit:
        tb = max(SUBLANE, _round_up(tb // 2, SUBLANE))
    assert vmem_estimate(tb) <= vmem_limit, (
        "hidden dims too large to fit the fused kernel in VMEM even at tb=8; "
        "split the hidden dimension or lower the weight precision")
    return tb, vmem_limit


# -----------------------------------------------------------------------------
# Forward
# -----------------------------------------------------------------------------
def noise_pred_forward(obs, prepared, *, tb=None):
    """obs: (B, transformer_hidden_dim) float32 -> (B, action_dim) float32."""
    D, H, A, Dp, Hp, Ap = prepared["dims"]
    weights = prepared["weights"]
    bias_pack = prepared["bias_pack"]
    matmul_dtype = prepared["matmul_dtype"]

    B = obs.shape[0]
    assert obs.shape == (B, D)

    const_bytes = (sum(int(np.prod(w.shape)) * w.dtype.itemsize for w in weights)
                   + bias_pack.size * bias_pack.dtype.itemsize)
    tb, vmem_limit = _select_tile(B, Dp, Hp, Ap, const_bytes, tb)

    # Fast path: no pad copy of obs when shapes already align.
    if D == Dp and B % tb == 0 and obs.dtype == jnp.float32:
        obs_in, Bp = obs, B
    else:
        Bp = _round_up(B, tb)
        obs_in = jnp.pad(obs.astype(jnp.float32), ((0, Bp - B), (0, Dp - D)))
    grid = Bp // tb

    kernel = functools.partial(noise_pred_kernel, d_true=D, h_true=H,
                               hp=Hp, ap=Ap, matmul_dtype=matmul_dtype)

    cost = pl.CostEstimate(
        flops=int(2 * Bp * (Dp * Hp + 2 * Hp * Hp + Hp * Ap)),
        transcendentals=int(3 * Bp * Hp + 4 * Bp),
        bytes_accessed=int(Bp * Dp * 4 + Bp * Ap * 4 + const_bytes),
    )

    def run(single_buffer_consts):
        if single_buffer_consts:
            # Grid-invariant operands: fetched once, single-buffered (halves VMEM).
            const_spec = lambda shape: pl.BlockSpec(
                shape, lambda i: (0, 0), pipeline_mode=pl.Buffered(1))
        else:
            const_spec = lambda shape: pl.BlockSpec(shape, lambda i: (0, 0))
        in_specs = ([pl.BlockSpec((tb, Dp), lambda i: (i, 0))]
                    + [const_spec(w.shape) for w in weights]
                    + [const_spec(bias_pack.shape)])
        return pl.pallas_call(
            kernel,
            out_shape=jax.ShapeDtypeStruct((Bp, Ap), jnp.float32),
            grid_spec=pltpu.PrefetchScalarGridSpec(
                num_scalar_prefetch=0,
                grid=(grid,),
                in_specs=in_specs,
                out_specs=pl.BlockSpec((tb, Ap), lambda i: (i, 0)),
            ),
            compiler_params=pltpu.CompilerParams(
                dimension_semantics=("parallel",),
                vmem_limit_bytes=int(vmem_limit),
            ),
            cost_estimate=cost,
        )(obs_in, *weights, bias_pack)

    try:
        out_p = run(True)
    except Exception:
        # Fallback if Buffered(1) single-buffering is not supported by this jax build.
        out_p = run(False)

    if Bp != B or Ap != A:
        out_p = out_p[:B, :A]
    return out_p


def noise_prediction_model(obs, params, *, tb=None, matmul_dtype=jnp.bfloat16):
    """Convenience wrapper (prepare + forward).  In production call
    prepare_noise_pred_params() ONCE and reuse it across forward calls."""
    prepared = prepare_noise_pred_params(params, matmul_dtype=matmul_dtype)
    return noise_pred_forward(obs, prepared, tb=tb)


# -----------------------------------------------------------------------------
# Parameter init + references
# -----------------------------------------------------------------------------
def init_params(key, transformer_hidden_dim, hidden_dim, action_dim):
    """Deterministic synthetic parameters (shapes as in the PyTorch module)."""
    ks = jax.random.split(key, 12)
    D, H, A = transformer_hidden_dim, hidden_dim, action_dim

    def lin(k, fan_in, fan_out):
        bound = 1.0 / float(np.sqrt(fan_in))
        kw, kb = jax.random.split(k)
        w = jax.random.uniform(kw, (fan_in, fan_out), jnp.float32, -bound, bound)
        b = jax.random.uniform(kb, (1, fan_out), jnp.float32, -bound, bound)
        return w, b

    def ln(kg, kb, n):   # non-trivial affine so the folding is actually exercised
        g = jax.random.uniform(kg, (1, n), jnp.float32, 0.5, 1.5)
        b = 0.1 * jax.random.normal(kb, (1, n), jnp.float32)
        return g, b

    fc1_w, fc1_b = lin(ks[0], D, H)
    b0_w, b0_b = lin(ks[1], H, H)
    b1_w, b1_b = lin(ks[2], H, H)
    fc2_w, fc2_b = lin(ks[3], H, A)
    ln1_g, ln1_b = ln(ks[4], ks[5], D)
    b0_ln_g, b0_ln_b = ln(ks[6], ks[7], H)
    b1_ln_g, b1_ln_b = ln(ks[8], ks[9], H)
    ln2_g, ln2_b = ln(ks[10], ks[11], H)
    return {
        "ln1_g": ln1_g, "ln1_b": ln1_b, "fc1_w": fc1_w, "fc1_b": fc1_b,
        "b0_ln_g": b0_ln_g, "b0_ln_b": b0_ln_b, "b0_w": b0_w, "b0_b": b0_b,
        "b1_ln_g": b1_ln_g, "b1_ln_b": b1_ln_b, "b1_w": b1_w, "b1_b": b1_b,
        "ln2_g": ln2_g, "ln2_b": ln2_b, "fc2_w": fc2_w, "fc2_b": fc2_b,
    }


def reference_forward_f64(obs, p):
    """NumPy float64 reference, faithful to the PyTorch module."""
    def ln(x, g, b):
        mu = x.mean(-1, keepdims=True)
        var = ((x - mu) ** 2).mean(-1, keepdims=True)   # biased, like PyTorch
        return (x - mu) / np.sqrt(var + EPS) * g + b

    def silu(x):
        return x / (1.0 + np.exp(-x))

    g = lambda k: np.asarray(p[k], np.float64)
    x = np.asarray(obs, np.float64)
    x = ln(x, g("ln1_g"), g("ln1_b"))
    x = silu(x @ g("fc1_w") + g("fc1_b"))
    for pre in ("b0_", "b1_"):
        h = ln(x, g(pre + "ln_g"), g(pre + "ln_b"))
        h = h @ g(pre + "w") + g(pre + "b")
        x = silu(h) + x
    x = ln(x, g("ln2_g"), g("ln2_b"))
    return x @ g("fc2_w") + g("fc2_b")


def reference_forward_mimic(obs, p, matmul_dtype=jnp.bfloat16):
    """JAX reference mimicking the kernel numerics (folded affine, two-pass LN,
    bf16 matmul operands with f32 accumulation)."""
    def fold(g, b_ln, w, b_lin):
        return ((g.reshape(-1, 1) * w).astype(matmul_dtype),
                b_ln.reshape(1, -1) @ w + b_lin)

    def norm(x):
        n = x.shape[-1]
        mu = jnp.sum(x, -1, keepdims=True) / n
        d = x - mu
        var = jnp.sum(d * d, -1, keepdims=True) / n
        return d * jax.lax.rsqrt(var + EPS)

    def mm(x, w, b):
        return jnp.dot(x.astype(matmul_dtype), w,
                       preferred_element_type=jnp.float32) + b

    def silu(x):
        return x * jax.nn.sigmoid(x)

    fc1_w, fc1_b = fold(p["ln1_g"], p["ln1_b"], p["fc1_w"], p["fc1_b"])
    b0_w, b0_b = fold(p["b0_ln_g"], p["b0_ln_b"], p["b0_w"], p["b0_b"])
    b1_w, b1_b = fold(p["b1_ln_g"], p["b1_ln_b"], p["b1_w"], p["b1_b"])
    fc2_w, fc2_b = fold(p["ln2_g"], p["ln2_b"], p["fc2_w"], p["fc2_b"])

    x = silu(mm(norm(obs), fc1_w, fc1_b))
    for w, b in ((b0_w, b0_b), (b1_w, b1_b)):
        x = silu(mm(norm(x), w, b)) + x
    return mm(norm(x), fc2_w, fc2_b)


if __name__ == "__main__":
    key = jax.random.PRNGKey(0)
    B, D_in, H, A = 16, 32, 32, 7   # batch, transformer_hidden_dim, hidden_dim, action_dim

    k_obs, k_params = jax.random.split(key)
    obs = jax.random.normal(k_obs, (B, D_in), jnp.float32)
    params = init_params(k_params, D_in, H, A)

    # Prepare once (fold + pad + cast hoisted off the hot path), then run the kernel.
    prepared = prepare_noise_pred_params(params)
    out = jax.block_until_ready(noise_pred_forward(obs, prepared))
    assert out.shape == (B, A)

    # Tight check vs. a JAX reference with the same numerics (bf16 operands, f32 acc).
    ref_mimic = reference_forward_mimic(obs, params)
    err_impl = float(jnp.max(jnp.abs(out - ref_mimic)))
    assert jnp.allclose(out, ref_mimic, atol=5e-3, rtol=5e-3), \
        f"implementation mismatch vs mimic reference (max abs err {err_impl})"

    # Semantic check vs. the float64, PyTorch-faithful reference (bf16-limited tolerance).
    ref64 = reference_forward_f64(obs, params)
    out64 = np.asarray(out, np.float64)
    err_sem = float(np.max(np.abs(out64 - ref64)))
    assert np.allclose(out64, ref64, atol=7e-2, rtol=7e-2), \
        f"semantic mismatch vs float64 reference (max abs err {err_sem})"

    print("KERNEL_OK")
</pallas_src>

<mosaic_0001>
module attributes {stable_mosaic.version = 11 : i64} {
  func.func @noise_pred_kernel(%arg0: i32, %arg1: memref<16x128xf32, #tpu.memory_space<vmem>>, %arg2: memref<128x128xbf16, #tpu.memory_space<vmem>>, %arg3: memref<128x128xbf16, #tpu.memory_space<vmem>>, %arg4: memref<128x128xbf16, #tpu.memory_space<vmem>>, %arg5: memref<128x128xbf16, #tpu.memory_space<vmem>>, %arg6: memref<8x128xf32, #tpu.memory_space<vmem>>, %arg7: memref<16x128xf32, #tpu.memory_space<vmem>>) attributes {dimension_semantics = [#tpu.dimension_semantics<parallel>], iteration_bounds = array<i64: 1>, scalar_prefetch = 0 : i64, scratch_operands = 0 : i64, tpu.core_type = #tpu.core_type<tc>, window_params = [{transform_indices = @transform_0, window_bounds = array<i64: 16, 128>}, {pipeline_mode = #tpu.pipeline_mode<synchronous>, transform_indices = @transform_1, window_bounds = array<i64: 128, 128>}, {pipeline_mode = #tpu.pipeline_mode<synchronous>, transform_indices = @transform_2, window_bounds = array<i64: 128, 128>}, {pipeline_mode = #tpu.pipeline_mode<synchronous>, transform_indices = @transform_3, window_bounds = array<i64: 128, 128>}, {pipeline_mode = #tpu.pipeline_mode<synchronous>, transform_indices = @transform_4, window_bounds = array<i64: 128, 128>}, {pipeline_mode = #tpu.pipeline_mode<synchronous>, transform_indices = @transform_5, window_bounds = array<i64: 8, 128>}, {transform_indices = @transform_6, window_bounds = array<i64: 16, 128>}]} {
    %c0 = arith.constant 0 : index
    %c0_0 = arith.constant 0 : index
    %0 = vector.load %arg6[%c0, %c0_0] : memref<8x128xf32, #tpu.memory_space<vmem>>, vector<8x128xf32>
    %1 = vector.extract_strided_slice %0 {offsets = [0, 0], sizes = [1, 128], strides = [1, 1]} : vector<8x128xf32> to vector<1x128xf32>
    %2 = vector.extract_strided_slice %0 {offsets = [1, 0], sizes = [1, 128], strides = [1, 1]} : vector<8x128xf32> to vector<1x128xf32>
    %3 = vector.extract_strided_slice %0 {offsets = [2, 0], sizes = [1, 128], strides = [1, 1]} : vector<8x128xf32> to vector<1x128xf32>
    %4 = vector.extract_strided_slice %0 {offsets = [3, 0], sizes = [1, 128], strides = [1, 1]} : vector<8x128xf32> to vector<1x128xf32>
    %c0_1 = arith.constant 0 : index
    %c0_2 = arith.constant 0 : index
    %5 = vector.load %arg1[%c0_1, %c0_2] : memref<16x128xf32, #tpu.memory_space<vmem>>, vector<16x128xf32>
    %cst = arith.constant dense<0.000000e+00> : vector<16xf32>
    %6 = vector.multi_reduction <add>, %5, %cst [1] : vector<16x128xf32> to vector<16xf32>
    %7 = vector.shape_cast %6 : vector<16xf32> to vector<16x1xf32>
    %cst_3 = arith.constant 3.125000e-02 : f32
    %8 = vector.broadcast %cst_3 : f32 to vector<16x1xf32>
    %9 = arith.mulf %7, %8 : vector<16x1xf32>
    %10 = vector.broadcast %9 : vector<16x1xf32> to vector<16x128xf32>
    %11 = arith.subf %5, %10 : vector<16x128xf32>
    %12 = tpu.iota {dimensions = array<i32: 1>} : vector<16x128xi32>
    %c32_i32 = arith.constant 32 : i32
    %13 = vector.broadcast %c32_i32 : i32 to vector<16x128xi32>
    %14 = arith.cmpi slt, %12, %13 : vector<16x128xi32>
    %cst_4 = arith.constant 0.000000e+00 : f32
    %15 = vector.broadcast %cst_4 : f32 to vector<16x128xf32>
    %16 = arith.select %14, %11, %15 : vector<16x128xi1>, vector<16x128xf32>
    %17 = arith.mulf %16, %16 : vector<16x128xf32>
    %cst_5 = arith.constant dense<0.000000e+00> : vector<16xf32>
    %18 = vector.multi_reduction <add>, %17, %cst_5 [1] : vector<16x128xf32> to vector<16xf32>
    %19 = vector.shape_cast %18 : vector<16xf32> to vector<16x1xf32>
    %cst_6 = arith.constant 3.125000e-02 : f32
    %20 = vector.broadcast %cst_6 : f32 to vector<16x1xf32>
    %21 = arith.mulf %19, %20 : vector<16x1xf32>
    %cst_7 = arith.constant 9.99999974E-6 : f32
    %22 = vector.broadcast %cst_7 : f32 to vector<16x1xf32>
    %23 = arith.addf %21, %22 : vector<16x1xf32>
    %24 = math.rsqrt %23 : vector<16x1xf32>
    %25 = vector.broadcast %24 : vector<16x1xf32> to vector<16x128xf32>
    %26 = arith.mulf %16, %25 : vector<16x128xf32>
    %27 = arith.truncf %26 : vector<16x128xf32> to vector<16x128xbf16>
    %c0_8 = arith.constant 0 : index
    %c0_9 = arith.constant 0 : index
    %28 = vector.load %arg2[%c0_8, %c0_9] : memref<128x128xbf16, #tpu.memory_space<vmem>>, vector<128x128xbf16>
    %cst_10 = arith.constant dense<0.000000e+00> : vector<16x128xf32>
    %29 = tpu.matmul %27, %28, %cst_10 {dimension_numbers = #tpu.dot_dimension_numbers<[1], [0], [0], [1], [0, 0, 1, 1], [], []>} : vector<16x128xbf16>, vector<128x128xbf16>, vector<16x128xf32> -> vector<16x128xf32>
    %30 = vector.broadcast %1 : vector<1x128xf32> to vector<16x128xf32>
    %31 = arith.addf %29, %30 : vector<16x128xf32>
    %32 = arith.negf %31 : vector<16x128xf32>
    %33 = math.exp %32 : vector<16x128xf32>
    %cst_11 = arith.constant 1.000000e+00 : f32
    %34 = vector.broadcast %cst_11 : f32 to vector<16x128xf32>
    %35 = arith.addf %34, %33 : vector<16x128xf32>
    %36 = arith.divf %34, %35 : vector<16x128xf32>
    %37 = arith.mulf %31, %36 : vector<16x128xf32>
    %cst_12 = arith.constant dense<0.000000e+00> : vector<16xf32>
    %38 = vector.multi_reduction <add>, %37, %cst_12 [1] : vector<16x128xf32> to vector<16xf32>
    %39 = vector.shape_cast %38 : vector<16xf32> to vector<16x1xf32>
    %cst_13 = arith.constant 3.125000e-02 : f32
    %40 = vector.broadcast %cst_13 : f32 to vector<16x1xf32>
    %41 = arith.mulf %39, %40 : vector<16x1xf32>
    %42 = vector.broadcast %41 : vector<16x1xf32> to vector<16x128xf32>
    %43 = arith.subf %37, %42 : vector<16x128xf32>
    %44 = tpu.iota {dimensions = array<i32: 1>} : vector<16x128xi32>
    %c32_i32_14 = arith.constant 32 : i32
    %45 = vector.broadcast %c32_i32_14 : i32 to vector<16x128xi32>
    %46 = arith.cmpi slt, %44, %45 : vector<16x128xi32>
    %cst_15 = arith.constant 0.000000e+00 : f32
    %47 = vector.broadcast %cst_15 : f32 to vector<16x128xf32>
    %48 = arith.select %46, %43, %47 : vector<16x128xi1>, vector<16x128xf32>
    %49 = arith.mulf %48, %48 : vector<16x128xf32>
    %cst_16 = arith.constant dense<0.000000e+00> : vector<16xf32>
    %50 = vector.multi_reduction <add>, %49, %cst_16 [1] : vector<16x128xf32> to vector<16xf32>
    %51 = vector.shape_cast %50 : vector<16xf32> to vector<16x1xf32>
    %cst_17 = arith.constant 3.125000e-02 : f32
    %52 = vector.broadcast %cst_17 : f32 to vector<16x1xf32>
    %53 = arith.mulf %51, %52 : vector<16x1xf32>
    %cst_18 = arith.constant 9.99999974E-6 : f32
    %54 = vector.broadcast %cst_18 : f32 to vector<16x1xf32>
    %55 = arith.addf %53, %54 : vector<16x1xf32>
    %56 = math.rsqrt %55 : vector<16x1xf32>
    %57 = vector.broadcast %56 : vector<16x1xf32> to vector<16x128xf32>
    %58 = arith.mulf %48, %57 : vector<16x128xf32>
    %59 = arith.truncf %58 : vector<16x128xf32> to vector<16x128xbf16>
    %c0_19 = arith.constant 0 : index
    %c0_20 = arith.constant 0 : index
    %60 = vector.load %arg3[%c0_19, %c0_20] : memref<128x128xbf16, #tpu.memory_space<vmem>>, vector<128x128xbf16>
    %cst_21 = arith.constant dense<0.000000e+00> : vector<16x128xf32>
    %61 = tpu.matmul %59, %60, %cst_21 {dimension_numbers = #tpu.dot_dimension_numbers<[1], [0], [0], [1], [0, 0, 1, 1], [], []>} : vector<16x128xbf16>, vector<128x128xbf16>, vector<16x128xf32> -> vector<16x128xf32>
    %62 = vector.broadcast %2 : vector<1x128xf32> to vector<16x128xf32>
    %63 = arith.addf %61, %62 : vector<16x128xf32>
    %64 = arith.negf %63 : vector<16x128xf32>
    %65 = math.exp %64 : vector<16x128xf32>
    %cst_22 = arith.constant 1.000000e+00 : f32
    %66 = vector.broadcast %cst_22 : f32 to vector<16x128xf32>
    %67 = arith.addf %66, %65 : vector<16x128xf32>
    %68 = arith.divf %66, %67 : vector<16x128xf32>
    %69 = arith.mulf %63, %68 : vector<16x128xf32>
    %70 = arith.addf %69, %37 : vector<16x128xf32>
    %cst_23 = arith.constant dense<0.000000e+00> : vector<16xf32>
    %71 = vector.multi_reduction <add>, %70, %cst_23 [1] : vector<16x128xf32> to vector<16xf32>
    %72 = vector.shape_cast %71 : vector<16xf32> to vector<16x1xf32>
    %cst_24 = arith.constant 3.125000e-02 : f32
    %73 = vector.broadcast %cst_24 : f32 to vector<16x1xf32>
    %74 = arith.mulf %72, %73 : vector<16x1xf32>
    %75 = vector.broadcast %74 : vector<16x1xf32> to vector<16x128xf32>
    %76 = arith.subf %70, %75 : vector<16x128xf32>
    %77 = tpu.iota {dimensions = array<i32: 1>} : vector<16x128xi32>
    %c32_i32_25 = arith.constant 32 : i32
    %78 = vector.broadcast %c32_i32_25 : i32 to vector<16x128xi32>
    %79 = arith.cmpi slt, %77, %78 : vector<16x128xi32>
    %cst_26 = arith.constant 0.000000e+00 : f32
    %80 = vector.broadcast %cst_26 : f32 to vector<16x128xf32>
    %81 = arith.select %79, %76, %80 : vector<16x128xi1>, vector<16x128xf32>
    %82 = arith.mulf %81, %81 : vector<16x128xf32>
    %cst_27 = arith.constant dense<0.000000e+00> : vector<16xf32>
    %83 = vector.multi_reduction <add>, %82, %cst_27 [1] : vector<16x128xf32> to vector<16xf32>
    %84 = vector.shape_cast %83 : vector<16xf32> to vector<16x1xf32>
    %cst_28 = arith.constant 3.125000e-02 : f32
    %85 = vector.broadcast %cst_28 : f32 to vector<16x1xf32>
    %86 = arith.mulf %84, %85 : vector<16x1xf32>
    %cst_29 = arith.constant 9.99999974E-6 : f32
    %87 = vector.broadcast %cst_29 : f32 to vector<16x1xf32>
    %88 = arith.addf %86, %87 : vector<16x1xf32>
    %89 = math.rsqrt %88 : vector<16x1xf32>
    %90 = vector.broadcast %89 : vector<16x1xf32> to vector<16x128xf32>
    %91 = arith.mulf %81, %90 : vector<16x128xf32>
    %92 = arith.truncf %91 : vector<16x128xf32> to vector<16x128xbf16>
    %c0_30 = arith.constant 0 : index
    %c0_31 = arith.constant 0 : index
    %93 = vector.load %arg4[%c0_30, %c0_31] : memref<128x128xbf16, #tpu.memory_space<vmem>>, vector<128x128xbf16>
    %cst_32 = arith.constant dense<0.000000e+00> : vector<16x128xf32>
    %94 = tpu.matmul %92, %93, %cst_32 {dimension_numbers = #tpu.dot_dimension_numbers<[1], [0], [0], [1], [0, 0, 1, 1], [], []>} : vector<16x128xbf16>, vector<128x128xbf16>, vector<16x128xf32> -> vector<16x128xf32>
    %95 = vector.broadcast %3 : vector<1x128xf32> to vector<16x128xf32>
    %96 = arith.addf %94, %95 : vector<16x128xf32>
    %97 = arith.negf %96 : vector<16x128xf32>
    %98 = math.exp %97 : vector<16x128xf32>
    %cst_33 = arith.constant 1.000000e+00 : f32
    %99 = vector.broadcast %cst_33 : f32 to vector<16x128xf32>
    %100 = arith.addf %99, %98 : vector<16x128xf32>
    %101 = arith.divf %99, %100 : vector<16x128xf32>
    %102 = arith.mulf %96, %101 : vector<16x128xf32>
    %103 = arith.addf %102, %70 : vector<16x128xf32>
    %cst_34 = arith.constant dense<0.000000e+00> : vector<16xf32>
    %104 = vector.multi_reduction <add>, %103, %cst_34 [1] : vector<16x128xf32> to vector<16xf32>
    %105 = vector.shape_cast %104 : vector<16xf32> to vector<16x1xf32>
    %cst_35 = arith.constant 3.125000e-02 : f32
    %106 = vector.broadcast %cst_35 : f32 to vector<16x1xf32>
    %107 = arith.mulf %105, %106 : vector<16x1xf32>
    %108 = vector.broadcast %107 : vector<16x1xf32> to vector<16x128xf32>
    %109 = arith.subf %103, %108 : vector<16x128xf32>
    %110 = tpu.iota {dimensions = array<i32: 1>} : vector<16x128xi32>
    %c32_i32_36 = arith.constant 32 : i32
    %111 = vector.broadcast %c32_i32_36 : i32 to vector<16x128xi32>
    %112 = arith.cmpi slt, %110, %111 : vector<16x128xi32>
    %cst_37 = arith.constant 0.000000e+00 : f32
    %113 = vector.broadcast %cst_37 : f32 to vector<16x128xf32>
    %114 = arith.select %112, %109, %113 : vector<16x128xi1>, vector<16x128xf32>
    %115 = arith.mulf %114, %114 : vector<16x128xf32>
    %cst_38 = arith.constant dense<0.000000e+00> : vector<16xf32>
    %116 = vector.multi_reduction <add>, %115, %cst_38 [1] : vector<16x128xf32> to vector<16xf32>
    %117 = vector.shape_cast %116 : vector<16xf32> to vector<16x1xf32>
    %cst_39 = arith.constant 3.125000e-02 : f32
    %118 = vector.broadcast %cst_39 : f32 to vector<16x1xf32>
    %119 = arith.mulf %117, %118 : vector<16x1xf32>
    %cst_40 = arith.constant 9.99999974E-6 : f32
    %120 = vector.broadcast %cst_40 : f32 to vector<16x1xf32>
    %121 = arith.addf %119, %120 : vector<16x1xf32>
    %122 = math.rsqrt %121 : vector<16x1xf32>
    %123 = vector.broadcast %122 : vector<16x1xf32> to vector<16x128xf32>
    %124 = arith.mulf %114, %123 : vector<16x128xf32>
    %125 = arith.truncf %124 : vector<16x128xf32> to vector<16x128xbf16>
    %c0_41 = arith.constant 0 : index
    %c0_42 = arith.constant 0 : index
    %126 = vector.load %arg5[%c0_41, %c0_42] : memref<128x128xbf16, #tpu.memory_space<vmem>>, vector<128x128xbf16>
    %cst_43 = arith.constant dense<0.000000e+00> : vector<16x128xf32>
    %127 = tpu.matmul %125, %126, %cst_43 {dimension_numbers = #tpu.dot_dimension_numbers<[1], [0], [0], [1], [0, 0, 1, 1], [], []>} : vector<16x128xbf16>, vector<128x128xbf16>, vector<16x128xf32> -> vector<16x128xf32>
    %128 = vector.broadcast %4 : vector<1x128xf32> to vector<16x128xf32>
    %129 = arith.addf %127, %128 : vector<16x128xf32>
    %c0_44 = arith.constant 0 : index
    %c0_45 = arith.constant 0 : index
    %130 = vector.load %arg7[%c0_44, %c0_45] : memref<16x128xf32, #tpu.memory_space<vmem>>, vector<16x128xf32>
    tpu.vector_store %arg7[%c0_44, %c0_45], %129 {strides = array<i32>} : memref<16x128xf32, #tpu.memory_space<vmem>>, vector<16x128xf32>,
    return
  }
  func.func @transform_0(%arg0: i32) -> (i32, i32) {
    %c0_i32 = arith.constant 0 : i32
    %c0_i32_0 = arith.constant 0 : i32
    return %arg0, %c0_i32 : i32, i32
  }
  func.func @transform_1(%arg0: i32) -> (i32, i32) {
    %c0_i32 = arith.constant 0 : i32
    %c0_i32_0 = arith.constant 0 : i32
    %c0_i32_1 = arith.constant 0 : i32
    return %c0_i32, %c0_i32_0 : i32, i32
  }
  func.func @transform_2(%arg0: i32) -> (i32, i32) {
    %c0_i32 = arith.constant 0 : i32
    %c0_i32_0 = arith.constant 0 : i32
    %c0_i32_1 = arith.constant 0 : i32
    return %c0_i32, %c0_i32_0 : i32, i32
  }
  func.func @transform_3(%arg0: i32) -> (i32, i32) {
    %c0_i32 = arith.constant 0 : i32
    %c0_i32_0 = arith.constant 0 : i32
    %c0_i32_1 = arith.constant 0 : i32
    return %c0_i32, %c0_i32_0 : i32, i32
  }
  func.func @transform_4(%arg0: i32) -> (i32, i32) {
    %c0_i32 = arith.constant 0 : i32
    %c0_i32_0 = arith.constant 0 : i32
    %c0_i32_1 = arith.constant 0 : i32
    return %c0_i32, %c0_i32_0 : i32, i32
  }
  func.func @transform_5(%arg0: i32) -> (i32, i32) {
    %c0_i32 = arith.constant 0 : i32
    %c0_i32_0 = arith.constant 0 : i32
    %c0_i32_1 = arith.constant 0 : i32
    return %c0_i32, %c0_i32_0 : i32, i32
  }
  func.func @transform_6(%arg0: i32) -> (i32, i32) {
    %c0_i32 = arith.constant 0 : i32
    %c0_i32_0 = arith.constant 0 : i32
    return %arg0, %c0_i32 : i32, i32
  }
}

module attributes {stable_mosaic.version = 11 : i64} {
  func.func @noise_pred_kernel(%arg0: i32, %arg1: memref<16x128xf32, #tpu.memory_space<vmem>>, %arg2: memref<128x128xbf16, #tpu.memory_space<vmem>>, %arg3: memref<128x128xbf16, #tpu.memory_space<vmem>>, %arg4: memref<128x128xbf16, #tpu.memory_space<vmem>>, %arg5: memref<128x128xbf16, #tpu.memory_space<vmem>>, %arg6: memref<8x128xf32, #tpu.memory_space<vmem>>, %arg7: memref<16x128xf32, #tpu.memory_space<vmem>>) attributes {dimension_semantics = [#tpu.dimension_semantics<parallel>], iteration_bounds = array<i64: 1>, scalar_prefetch = 0 : i64, scratch_operands = 0 : i64, tpu.core_type = #tpu.core_type<tc>, window_params = [{transform_indices = @transform_0, window_bounds = array<i64: 16, 128>}, {pipeline_mode = #tpu.pipeline_mode<synchronous>, transform_indices = @transform_1, window_bounds = array<i64: 128, 128>}, {pipeline_mode = #tpu.pipeline_mode<synchronous>, transform_indices = @transform_2, window_bounds = array<i64: 128, 128>}, {pipeline_mode = #tpu.pipeline_mode<synchronous>, transform_indices = @transform_3, window_bounds = array<i64: 128, 128>}, {pipeline_mode = #tpu.pipeline_mode<synchronous>, transform_indices = @transform_4, window_bounds = array<i64: 128, 128>}, {pipeline_mode = #tpu.pipeline_mode<synchronous>, transform_indices = @transform_5, window_bounds = array<i64: 8, 128>}, {transform_indices = @transform_6, window_bounds = array<i64: 16, 128>}]} {
    %c0 = arith.constant 0 : index
    %c0_0 = arith.constant 0 : index
    %0 = vector.load %arg6[%c0, %c0_0] : memref<8x128xf32, #tpu.memory_space<vmem>>, vector<8x128xf32>
    %1 = vector.extract_strided_slice %0 {offsets = [0, 0], sizes = [1, 128], strides = [1, 1]} : vector<8x128xf32> to vector<1x128xf32>
    %2 = vector.extract_strided_slice %0 {offsets = [1, 0], sizes = [1, 128], strides = [1, 1]} : vector<8x128xf32> to vector<1x128xf32>
    %3 = vector.extract_strided_slice %0 {offsets = [2, 0], sizes = [1, 128], strides = [1, 1]} : vector<8x128xf32> to vector<1x128xf32>
    %4 = vector.extract_strided_slice %0 {offsets = [3, 0], sizes = [1, 128], strides = [1, 1]} : vector<8x128xf32> to vector<1x128xf32>
    %c0_1 = arith.constant 0 : index
    %c0_2 = arith.constant 0 : index
    %5 = vector.load %arg1[%c0_1, %c0_2] : memref<16x128xf32, #tpu.memory_space<vmem>>, vector<16x128xf32>
    %cst = arith.constant dense<0.000000e+00> : vector<16xf32>
    %6 = vector.multi_reduction <add>, %5, %cst [1] : vector<16x128xf32> to vector<16xf32>
    %7 = vector.shape_cast %6 : vector<16xf32> to vector<16x1xf32>
    %cst_3 = arith.constant 3.125000e-02 : f32
    %8 = vector.broadcast %cst_3 : f32 to vector<16x1xf32>
    %9 = arith.mulf %7, %8 : vector<16x1xf32>
    %10 = vector.broadcast %9 : vector<16x1xf32> to vector<16x128xf32>
    %11 = arith.subf %5, %10 : vector<16x128xf32>
    %12 = tpu.iota {dimensions = array<i32: 1>} : vector<16x128xi32>
    %c32_i32 = arith.constant 32 : i32
    %13 = vector.broadcast %c32_i32 : i32 to vector<16x128xi32>
    %14 = arith.cmpi slt, %12, %13 : vector<16x128xi32>
    %cst_4 = arith.constant 0.000000e+00 : f32
    %15 = vector.broadcast %cst_4 : f32 to vector<16x128xf32>
    %16 = arith.select %14, %11, %15 : vector<16x128xi1>, vector<16x128xf32>
    %17 = arith.mulf %16, %16 : vector<16x128xf32>
    %cst_5 = arith.constant dense<0.000000e+00> : vector<16xf32>
    %18 = vector.multi_reduction <add>, %17, %cst_5 [1] : vector<16x128xf32> to vector<16xf32>
    %19 = vector.shape_cast %18 : vector<16xf32> to vector<16x1xf32>
    %cst_6 = arith.constant 3.125000e-02 : f32
    %20 = vector.broadcast %cst_6 : f32 to vector<16x1xf32>
    %21 = arith.mulf %19, %20 : vector<16x1xf32>
    %cst_7 = arith.constant 9.99999974E-6 : f32
    %22 = vector.broadcast %cst_7 : f32 to vector<16x1xf32>
    %23 = arith.addf %21, %22 : vector<16x1xf32>
    %24 = math.rsqrt %23 : vector<16x1xf32>
    %25 = vector.broadcast %24 : vector<16x1xf32> to vector<16x128xf32>
    %26 = arith.mulf %16, %25 : vector<16x128xf32>
    %27 = arith.truncf %26 : vector<16x128xf32> to vector<16x128xbf16>
    %c0_8 = arith.constant 0 : index
    %c0_9 = arith.constant 0 : index
    %28 = vector.load %arg2[%c0_8, %c0_9] : memref<128x128xbf16, #tpu.memory_space<vmem>>, vector<128x128xbf16>
    %cst_10 = arith.constant dense<0.000000e+00> : vector<16x128xf32>
    %29 = tpu.matmul %27, %28, %cst_10 {dimension_numbers = #tpu.dot_dimension_numbers<[1], [0], [0], [1], [0, 0, 1, 1], [], []>} : vector<16x128xbf16>, vector<128x128xbf16>, vector<16x128xf32> -> vector<16x128xf32>
    %30 = vector.broadcast %1 : vector<1x128xf32> to vector<16x128xf32>
    %31 = arith.addf %29, %30 : vector<16x128xf32>
    %32 = arith.negf %31 : vector<16x128xf32>
    %33 = math.exp %32 : vector<16x128xf32>
    %cst_11 = arith.constant 1.000000e+00 : f32
    %34 = vector.broadcast %cst_11 : f32 to vector<16x128xf32>
    %35 = arith.addf %34, %33 : vector<16x128xf32>
    %36 = arith.divf %34, %35 : vector<16x128xf32>
    %37 = arith.mulf %31, %36 : vector<16x128xf32>
    %cst_12 = arith.constant dense<0.000000e+00> : vector<16xf32>
    %38 = vector.multi_reduction <add>, %37, %cst_12 [1] : vector<16x128xf32> to vector<16xf32>
    %39 = vector.shape_cast %38 : vector<16xf32> to vector<16x1xf32>
    %cst_13 = arith.constant 3.125000e-02 : f32
    %40 = vector.broadcast %cst_13 : f32 to vector<16x1xf32>
    %41 = arith.mulf %39, %40 : vector<16x1xf32>
    %42 = vector.broadcast %41 : vector<16x1xf32> to vector<16x128xf32>
    %43 = arith.subf %37, %42 : vector<16x128xf32>
    %44 = tpu.iota {dimensions = array<i32: 1>} : vector<16x128xi32>
    %c32_i32_14 = arith.constant 32 : i32
    %45 = vector.broadcast %c32_i32_14 : i32 to vector<16x128xi32>
    %46 = arith.cmpi slt, %44, %45 : vector<16x128xi32>
    %cst_15 = arith.constant 0.000000e+00 : f32
    %47 = vector.broadcast %cst_15 : f32 to vector<16x128xf32>
    %48 = arith.select %46, %43, %47 : vector<16x128xi1>, vector<16x128xf32>
    %49 = arith.mulf %48, %48 : vector<16x128xf32>
    %cst_16 = arith.constant dense<0.000000e+00> : vector<16xf32>
    %50 = vector.multi_reduction <add>, %49, %cst_16 [1] : vector<16x128xf32> to vector<16xf32>
    %51 = vector.shape_cast %50 : vector<16xf32> to vector<16x1xf32>
    %cst_17 = arith.constant 3.125000e-02 : f32
    %52 = vector.broadcast %cst_17 : f32 to vector<16x1xf32>
    %53 = arith.mulf %51, %52 : vector<16x1xf32>
    %cst_18 = arith.constant 9.99999974E-6 : f32
    %54 = vector.broadcast %cst_18 : f32 to vector<16x1xf32>
    %55 = arith.addf %53, %54 : vector<16x1xf32>
    %56 = math.rsqrt %55 : vector<16x1xf32>
    %57 = vector.broadcast %56 : vector<16x1xf32> to vector<16x128xf32>
    %58 = arith.mulf %48, %57 : vector<16x128xf32>
    %59 = arith.truncf %58 : vector<16x128xf32> to vector<16x128xbf16>
    %c0_19 = arith.constant 0 : index
    %c0_20 = arith.constant 0 : index
    %60 = vector.load %arg3[%c0_19, %c0_20] : memref<128x128xbf16, #tpu.memory_space<vmem>>, vector<128x128xbf16>
    %cst_21 = arith.constant dense<0.000000e+00> : vector<16x128xf32>
    %61 = tpu.matmul %59, %60, %cst_21 {dimension_numbers = #tpu.dot_dimension_numbers<[1], [0], [0], [1], [0, 0, 1, 1], [], []>} : vector<16x128xbf16>, vector<128x128xbf16>, vector<16x128xf32> -> vector<16x128xf32>
    %62 = vector.broadcast %2 : vector<1x128xf32> to vector<16x128xf32>
    %63 = arith.addf %61, %62 : vector<16x128xf32>
    %64 = arith.negf %63 : vector<16x128xf32>
    %65 = math.exp %64 : vector<16x128xf32>
    %cst_22 = arith.constant 1.000000e+00 : f32
    %66 = vector.broadcast %cst_22 : f32 to vector<16x128xf32>
    %67 = arith.addf %66, %65 : vector<16x128xf32>
    %68 = arith.divf %66, %67 : vector<16x128xf32>
    %69 = arith.mulf %63, %68 : vector<16x128xf32>
    %70 = arith.addf %69, %37 : vector<16x128xf32>
    %cst_23 = arith.constant dense<0.000000e+00> : vector<16xf32>
    %71 = vector.multi_reduction <add>, %70, %cst_23 [1] : vector<16x128xf32> to vector<16xf32>
    %72 = vector.shape_cast %71 : vector<16xf32> to vector<16x1xf32>
    %cst_24 = arith.constant 3.125000e-02 : f32
    %73 = vector.broadcast %cst_24 : f32 to vector<16x1xf32>
    %74 = arith.mulf %72, %73 : vector<16x1xf32>
    %75 = vector.broadcast %74 : vector<16x1xf32> to vector<16x128xf32>
    %76 = arith.subf %70, %75 : vector<16x128xf32>
    %77 = tpu.iota {dimensions = array<i32: 1>} : vector<16x128xi32>
    %c32_i32_25 = arith.constant 32 : i32
    %78 = vector.broadcast %c32_i32_25 : i32 to vector<16x128xi32>
    %79 = arith.cmpi slt, %77, %78 : vector<16x128xi32>
    %cst_26 = arith.constant 0.000000e+00 : f32
    %80 = vector.broadcast %cst_26 : f32 to vector<16x128xf32>
    %81 = arith.select %79, %76, %80 : vector<16x128xi1>, vector<16x128xf32>
    %82 = arith.mulf %81, %81 : vector<16x128xf32>
    %cst_27 = arith.constant dense<0.000000e+00> : vector<16xf32>
    %83 = vector.multi_reduction <add>, %82, %cst_27 [1] : vector<16x128xf32> to vector<16xf32>
    %84 = vector.shape_cast %83 : vector<16xf32> to vector<16x1xf32>
    %cst_28 = arith.constant 3.125000e-02 : f32
    %85 = vector.broadcast %cst_28 : f32 to vector<16x1xf32>
    %86 = arith.mulf %84, %85 : vector<16x1xf32>
    %cst_29 = arith.constant 9.99999974E-6 : f32
    %87 = vector.broadcast %cst_29 : f32 to vector<16x1xf32>
    %88 = arith.addf %86, %87 : vector<16x1xf32>
    %89 = math.rsqrt %88 : vector<16x1xf32>
    %90 = vector.broadcast %89 : vector<16x1xf32> to vector<16x128xf32>
    %91 = arith.mulf %81, %90 : vector<16x128xf32>
    %92 = arith.truncf %91 : vector<16x128xf32> to vector<16x128xbf16>
    %c0_30 = arith.constant 0 : index
    %c0_31 = arith.constant 0 : index
    %93 = vector.load %arg4[%c0_30, %c0_31] : memref<128x128xbf16, #tpu.memory_space<vmem>>, vector<128x128xbf16>
    %cst_32 = arith.constant dense<0.000000e+00> : vector<16x128xf32>
    %94 = tpu.matmul %92, %93, %cst_32 {dimension_numbers = #tpu.dot_dimension_numbers<[1], [0], [0], [1], [0, 0, 1, 1], [], []>} : vector<16x128xbf16>, vector<128x128xbf16>, vector<16x128xf32> -> vector<16x128xf32>
    %95 = vector.broadcast %3 : vector<1x128xf32> to vector<16x128xf32>
    %96 = arith.addf %94, %95 : vector<16x128xf32>
    %97 = arith.negf %96 : vector<16x128xf32>
    %98 = math.exp %97 : vector<16x128xf32>
    %cst_33 = arith.constant 1.000000e+00 : f32
    %99 = vector.broadcast %cst_33 : f32 to vector<16x128xf32>
    %100 = arith.addf %99, %98 : vector<16x128xf32>
    %101 = arith.divf %99, %100 : vector<16x128xf32>
    %102 = arith.mulf %96, %101 : vector<16x128xf32>
    %103 = arith.addf %102, %70 : vector<16x128xf32>
    %cst_34 = arith.constant dense<0.000000e+00> : vector<16xf32>
    %104 = vector.multi_reduction <add>, %103, %cst_34 [1] : vector<16x128xf32> to vector<16xf32>
    %105 = vector.shape_cast %104 : vector<16xf32> to vector<16x1xf32>
    %cst_35 = arith.constant 3.125000e-02 : f32
    %106 = vector.broadcast %cst_35 : f32 to vector<16x1xf32>
    %107 = arith.mulf %105, %106 : vector<16x1xf32>
    %108 = vector.broadcast %107 : vector<16x1xf32> to vector<16x128xf32>
    %109 = arith.subf %103, %108 : vector<16x128xf32>
    %110 = tpu.iota {dimensions = array<i32: 1>} : vector<16x128xi32>
    %c32_i32_36 = arith.constant 32 : i32
    %111 = vector.broadcast %c32_i32_36 : i32 to vector<16x128xi32>
    %112 = arith.cmpi slt, %110, %111 : vector<16x128xi32>
    %cst_37 = arith.constant 0.000000e+00 : f32
    %113 = vector.broadcast %cst_37 : f32 to vector<16x128xf32>
    %114 = arith.select %112, %109, %113 : vector<16x128xi1>, vector<16x128xf32>
    %115 = arith.mulf %114, %114 : vector<16x128xf32>
    %cst_38 = arith.constant dense<0.000000e+00> : vector<16xf32>
    %116 = vector.multi_reduction <add>, %115, %cst_38 [1] : vector<16x128xf32> to vector<16xf32>
    %117 = vector.shape_cast %116 : vector<16xf32> to vector<16x1xf32>
    %cst_39 = arith.constant 3.125000e-02 : f32
    %118 = vector.broadcast %cst_39 : f32 to vector<16x1xf32>
    %119 = arith.mulf %117, %118 : vector<16x1xf32>
    %cst_40 = arith.constant 9.99999974E-6 : f32
    %120 = vector.broadcast %cst_40 : f32 to vector<16x1xf32>
    %121 = arith.addf %119, %120 : vector<16x1xf32>
    %122 = math.rsqrt %121 : vector<16x1xf32>
    %123 = vector.broadcast %122 : vector<16x1xf32> to vector<16x128xf32>
    %124 = arith.mulf %114, %123 : vector<16x128xf32>
    %125 = arith.truncf %124 : vector<16x128xf32> to vector<16x128xbf16>
    %c0_41 = arith.constant 0 : index
    %c0_42 = arith.constant 0 : index
    %126 = vector.load %arg5[%c0_41, %c0_42] : memref<128x128xbf16, #tpu.memory_space<vmem>>, vector<128x128xbf16>
    %cst_43 = arith.constant dense<0.000000e+00> : vector<16x128xf32>
    %127 = tpu.matmul %125, %126, %cst_43 {dimension_numbers = #tpu.dot_dimension_numbers<[1], [0], [0], [1], [0, 0, 1, 1], [], []>} : vector<16x128xbf16>, vector<128x128xbf16>, vector<16x128xf32> -> vector<16x128xf32>
    %128 = vector.broadcast %4 : vector<1x128xf32> to vector<16x128xf32>
    %129 = arith.addf %127, %128 : vector<16x128xf32>
    %c0_44 = arith.constant 0 : index
    %c0_45 = arith.constant 0 : index
    %130 = vector.load %arg7[%c0_44, %c0_45] : memref<16x128xf32, #tpu.memory_space<vmem>>, vector<16x128xf32>
    tpu.vector_store %arg7[%c0_44, %c0_45], %129 {strides = array<i32>} : memref<16x128xf32, #tpu.memory_space<vmem>>, vector<16x128xf32>,
    return
  }
  func.func @transform_0(%arg0: i32) -> (i32, i32) {
    %c0_i32 = arith.constant 0 : i32
    %c0_i32_0 = arith.constant 0 : i32
    return %arg0, %c0_i32 : i32, i32
  }
  func.func @transform_1(%arg0: i32) -> (i32, i32) {
    %c0_i32 = arith.constant 0 : i32
    %c0_i32_0 = arith.constant 0 : i32
    %c0_i32_1 = arith.constant 0 : i32
    return %c0_i32, %c0_i32_0 : i32, i32
  }
  func.func @transform_2(%arg0: i32) -> (i32, i32) {
    %c0_i32 = arith.constant 0 : i32
    %c0_i32_0 = arith.constant 0 : i32
    %c0_i32_1 = arith.constant 0 : i32
    return %c0_i32, %c0_i32_0 : i32, i32
  }
  func.func @transform_3(%arg0: i32) -> (i32, i32) {
    %c0_i32 = arith.constant 0 : i32
    %c0_i32_0 = arith.constant 0 : i32
    %c0_i32_1 = arith.constant 0 : i32
    return %c0_i32, %c0_i32_0 : i32, i32
  }
  func.func @transform_4(%arg0: i32) -> (i32, i32) {
    %c0_i32 = arith.constant 0 : i32
    %c0_i32_0 = arith.constant 0 : i32
    %c0_i32_1 = arith.constant 0 : i32
    return %c0_i32, %c0_i32_0 : i32, i32
  }
  func.func @transform_5(%arg0: i32) -> (i32, i32) {
    %c0_i32 = arith.constant 0 : i32
    %c0_i32_0 = arith.constant 0 : i32
    %c0_i32_1 = arith.constant 0 : i32
    return %c0_i32, %c0_i32_0 : i32, i32
  }
  func.func @transform_6(%arg0: i32) -> (i32, i32) {
    %c0_i32 = arith.constant 0 : i32
    %c0_i32_0 = arith.constant 0 : i32
    return %arg0, %c0_i32 : i32, i32
  }
}

</mosaic_0001>

<bundles_post_ra>
// kernel: tpu_custom_call.1
= control target key start
LH: loop header
LB: loop body
LE: loop exit
PB: predicated region body
PF: predicated region fallthrough
CT: control target
= control target key end

     0   :  { %11 = vsyncpa [#allocation3], 0  ;;  %s1245_s0 = inlined_call_operand.hbm [shape: f32[16,128], index: 0, kind: input, shape index: {}]   ;;  %s1246_s1 = inlined_call_operand.hbm [shape: bf16[128,128], index: 1, kind: input, shape index: {}]   ;;  %s1247_s2 = inlined_call_operand.hbm [shape: bf16[128,128], index: 2, kind: input, shape index: {}]   ;;  %s1248_s3 = inlined_call_operand.hbm [shape: bf16[128,128], index: 3, kind: input, shape index: {}]   ;;  %s1249_s4 = inlined_call_operand.hbm [shape: bf16[128,128], index: 4, kind: input, shape index: {}]   ;;  %s1250_s5 = inlined_call_operand.vmem [shape: f32[8,128], index: 5, kind: input, shape index: {}]   ;;  %s1251_s6 = inlined_call_operand.hbm [shape: f32[16,128], index: 6, kind: output, shape index: {}]  }
   0x1   :  { %12 = vsyncpa [#allocation6], 0 }
   0x2   :  { %13 = vsyncpa [#allocation9], 0 }
   0x3   :  { %14 = vsyncpa [#allocation4], 0  ;;  %s1068_s21 = smov [#allocation5]  }
   0x4   :  { %s32_s22 = sshll.u32 %s1068_s21, 4  ;;  %s33_s22 = int_to_ptr.vmem [resolvable:$true] %s32_s22 }
   0x5   :  { %s948_s23 = scalar_lea.vmem %s33_s22, 1024  ;;  %p953_p1 = scmp.lt.s32.totalorder %s33_s22, %s33_s22 }
   0x6   :  { %p949_p0 = scmp.ne.s32.totalorder %s33_s22, %s948_s23  ;;  %p954_p2 = scmp.lt.s32.totalorder %s948_s23, %s948_s23 }
   0x8   :  { %p955_p3 = por %p954_p2, %p953_p1 }
   0xa   :  { %p956_p4 = pnand %p955_p3, %p949_p0 }
   0xc   :  { %959 = shalt.err (!%p956_p4)
}
   0xd   :  { %s1069_s24 = smov 64   ;;  %s1070_s25 = smov 4  }
   0xe   :  { %38 = dma.hbm_to_vmem [thread:$0]  %s1246_s1, 1024, %s33_s22, [#allocation6], %s1069_s24, %s1069_s24, %s1070_s25  }
   0xf   :  { %s1071_s28 = smov [#allocation8]   ;;  %s1072_s30 = smov [#allocation2]  }
  0x10   :  { %s56_s29 = sshll.u32 %s1071_s28, 4  ;;  %s20_s7 = sshll.u32 %s1072_s30, 4  ;;  %s57_s29 = int_to_ptr.vmem [resolvable:$true] %s56_s29  ;;  %s21_s7 = int_to_ptr.vmem [resolvable:$true] %s20_s7 }
  0x11   :  { %s968_s8 = scalar_lea.vmem %s57_s29, 1024  ;;  %p973_p6 = scmp.lt.s32.totalorder %s57_s29, %s57_s29 }
  0x12   :  { %p969_p5 = scmp.ne.s32.totalorder %s57_s29, %s968_s8  ;;  %p974_p7 = scmp.lt.s32.totalorder %s968_s8, %s968_s8 }
  0x14   :  { %p975_p8 = por %p974_p7, %p973_p6 }
  0x16   :  { %p976_p9 = pnand %p975_p8, %p969_p5 }
  0x18   :  { %979 = shalt.err (!%p976_p9)
}
  0x19   :  { %62 = dma.hbm_to_vmem [thread:$0]  %s1248_s3, 1024, %s57_s29, [#allocation9], %s1069_s24, %s1069_s24, %s1070_s25  }
  0x1a   :  { %s988_s1 = scalar_lea.vmem %s21_s7, 256  ;;  %p993_p11 = scmp.lt.s32.totalorder %s21_s7, %s21_s7 }
  0x1b   :  { %p989_p10 = scmp.ne.s32.totalorder %s21_s7, %s988_s1  ;;  %p994_p12 = scmp.lt.s32.totalorder %s988_s1, %s988_s1 }
  0x1d   :  { %p995_p13 = por %p994_p12, %p993_p11 }
  0x1f   :  { %p996_p0 = pnand %p995_p13, %p989_p10 }
  0x21   :  { %999 = shalt.err (!%p996_p0)
}
  0x22   :  { %s1073_s11 = smov 128   ;;  %s1074_s12 = smov 8  }
  0x23   :  { %26 = dma.hbm_to_vmem [thread:$0]  %s1245_s0, 256, %s21_s7, [#allocation3], %s1073_s11, %s1073_s11, %s1074_s12  }
  0x24   :  { %s1075_s15 = smov [#allocation7]   ;;  %s1076_s3 = smov [#allocation10]  }
  0x25   :  { %s44_s16 = sshll.u32 %s1075_s15, 4  ;;  %s68_s17 = sshll.u32 %s1076_s3, 4  ;;  %s45_s16 = int_to_ptr.vmem [resolvable:$true] %s44_s16  ;;  %s69_s17 = int_to_ptr.vmem [resolvable:$true] %s68_s17 }
  0x26   :  { %s1008_s18 = scalar_lea.vmem %s45_s16, 1024  ;;  %p1013_p2 = scmp.lt.s32.totalorder %s45_s16, %s45_s16 }
  0x27   :  { %p1009_p1 = scmp.ne.s32.totalorder %s45_s16, %s1008_s18  ;;  %p1014_p3 = scmp.lt.s32.totalorder %s1008_s18, %s1008_s18 }
  0x29   :  { %p1015_p4 = por %p1014_p3, %p1013_p2 }
  0x2b   :  { %p1016_p5 = pnand %p1015_p4, %p1009_p1 }
  0x2d   :  { %1019 = shalt.err (!%p1016_p5)
}
  0x2e   :  { %50 = dma.hbm_to_vmem [thread:$0]  %s1247_s2, 1024, %s45_s16, [#allocation6], %s1069_s24, %s1069_s24, %s1070_s25  }
  0x2f   :  { %s1028_s0 = scalar_lea.vmem %s69_s17, 1024  ;;  %p1033_p7 = scmp.lt.s32.totalorder %s69_s17, %s69_s17 }
  0x30   :  { %p1029_p6 = scmp.ne.s32.totalorder %s69_s17, %s1028_s0  ;;  %p1034_p8 = scmp.lt.s32.totalorder %s1028_s0, %s1028_s0 }
  0x32   :  { %p1035_p9 = por %p1034_p8, %p1033_p7 }
  0x34   :  { %p1036_p10 = pnand %p1035_p9, %p1029_p6 }
  0x36   :  { %1039 = shalt.err (!%p1036_p10)
}
  0x37   :  { %74 = dma.hbm_to_vmem [thread:$0]  %s1249_s4, 1024, %s69_s17, [#allocation9], %s1069_s24, %s1069_s24, %s1070_s25  }
  0x38   :  { %1060 = dma.done.wait [#allocation3], 256  }
  0x39   :  { %1061 = vsyncadd [#allocation3], 4294967040 }
  0x3a   :  { %1062 = dma.done.wait [#allocation6], 2048  }
  0x3b   :  { %1063 = vsyncadd [#allocation6], 4294965248 }
  0x3c   :  { %1064 = dma.done.wait [#allocation9], 2048  }
  0x3d   :  { %1065 = vsyncadd [#allocation9], 4294965248  ;;  %v94_v0 = vld [vmem:[#allocation2] sm:$0xff]  ;;  %v95_v1 = vld [vmem:[#allocation2 + $0x8] sm:$0xff]  ;;  %v1077_v3 = vmov 0.0   ;;  %v104_v5 = vlaneseq  ;;  %vm1078_vm1 = vmmov 0  }
  0x3e   :  { %96 = vadd.xlane.f32.xlu0 %v94_v0  ;;  %v868_v2 = vld [vmem:[#allocation5 + $0x38] sm:$0xff]   ;;  %776 = vmatprep.subr.bf16.mxu0 %v1077_v3  ;;  %v869_v4 = vld [vmem:[#allocation5 + $0x30] sm:$0xff]   ;;  %v870_v17 = vld [vmem:[#allocation5 + $0x28] sm:$0xff]  }
  0x3f   :  { %796 = vmatprep.subr.bf16.mxu1 %v1077_v3  ;;  %777 = vmatpush3.bf16.msra.mxu0 %v868_v2  ;;  %v1149_v6 = vand.u32 127, %v104_v5  ;;  %v871_v18 = vld [vmem:[#allocation5 + $0x20] sm:$0xff]   ;;  %v872_v19 = vld [vmem:[#allocation5 + $0x18] sm:$0xff]   ;;  %v873_v20 = vld [vmem:[#allocation5 + $0x10] sm:$0xff]   ;;  %v1168_v34 = vshrl.u32 %v104_v5, 7 }
  0x40   :  { %778 = vmatprep.subr.bf16.mxu0 %v1077_v3  ;;  %792 = vmatprep.mubr.msk.bf16.mxu0 %vm1078_vm1, %v1077_v3  ;;  %v874_v21 = vld [vmem:[#allocation5 + $0x8] sm:$0xff]   ;;  %v875_v22 = vld [vmem:[#allocation5] sm:$0xff]   ;;  %v1174_v36 = vld [vmem:[%s1250_s5] sm:$0xff]  ;;  %s1079_s5 = smov [#allocation11]  }
  0x41   :  { %vm106_vm0 = vcmp.lt.s32.totalorder %v1149_v6, 32  ;;  %812 = vmatprep.mubr.msk.bf16.mxu1 %vm1078_vm1, %v1077_v3  ;;  %v142_v35 = vsub.s32 0, %v1168_v34  ;;  %v876_v54 = vld [vmem:[#allocation7 + $0x38] sm:$0xff]   ;;  %v877_v55 = vld [vmem:[#allocation7 + $0x30] sm:$0xff]   ;;  %v878_v2 = vld [vmem:[#allocation7 + $0x28] sm:$0xff]   ;;  %s688_s23 = sshll.u32 %s1079_s5, 4  ;;  %s689_s23 = int_to_ptr.vmem [resolvable:$true] %s688_s23 }
  0x42   :  { %98 = vadd.xlane.f32.xlu0 %v95_v1  ;;  %797 = vmatpush3.bf16.msra.mxu1 %v876_v54  ;;  %v880_v5 = vld [vmem:[#allocation7 + $0x18] sm:$0xff]   ;;  %v899_v6 = vld [vmem:[#allocation10] sm:$0xff]   ;;  %s1040_s24 = scalar_lea.vmem %s689_s23, 256  ;;  %p1045_p12 = scmp.lt.s32.totalorder %s689_s23, %s689_s23 }
  0x43   :  { %779 = vmatpush3.bf16.msra.mxu0 %v869_v4  ;;  %v143_v37 = vrot.slane %v1174_v36, %v142_v35  ;;  %798 = vmatprep.subr.bf16.mxu1 %v1077_v3  ;;  %v879_v4 = vld [vmem:[#allocation7 + $0x20] sm:$0xff]   ;;  %p1041_p11 = scmp.ne.s32.totalorder %s689_s23, %s1040_s24  ;;  %p1046_p13 = scmp.lt.s32.totalorder %s1040_s24, %s1040_s24 }
  0x44   :  { %780 = vmatprep.subr.bf16.mxu0 %v1077_v3 }
  0x45   :  { %p1047_p0 = por %p1046_p13, %p1045_p12 }
  0x46   :  { %799 = vmatpush3.bf16.msra.mxu1 %v877_v55  ;;  %v886_v55 = vld [vmem:[#allocation8 + $0x28] sm:$0xff]  }
  0x47   :  { %781 = vmatpush3.bf16.msra.mxu0 %v870_v17  ;;  %800 = vmatprep.subr.bf16.mxu1 %v1077_v3  ;;  %p1048_p1 = pnand %p1047_p0, %p1041_p11 }
  0x48   :  { %782 = vmatprep.subr.bf16.mxu0 %v1077_v3 }
  0x4a   :  { %801 = vmatpush3.bf16.msra.mxu1 %v878_v2 }
  0x4b   :  { %783 = vmatpush3.bf16.msra.mxu0 %v871_v18  ;;  %802 = vmatprep.subr.bf16.mxu1 %v1077_v3 }
  0x4c   :  { %784 = vmatprep.subr.bf16.mxu0 %v1077_v3 }
  0x4e   :  { %803 = vmatpush3.bf16.msra.mxu1 %v879_v4 }
  0x4f   :  { %785 = vmatpush3.bf16.msra.mxu0 %v872_v19  ;;  %804 = vmatprep.subr.bf16.mxu1 %v1077_v3 }
  0x50   :  { %786 = vmatprep.subr.bf16.mxu0 %v1077_v3 }
  0x52   :  { %805 = vmatpush3.bf16.msra.mxu1 %v880_v5 }
  0x53   :  { %787 = vmatpush3.bf16.msra.mxu0 %v873_v20  ;;  %806 = vmatprep.subr.bf16.mxu1 %v1077_v3 }
  0x54   :  { %788 = vmatprep.subr.bf16.mxu0 %v1077_v3 }
  0x57   :  { %789 = vmatpush3.bf16.msra.mxu0 %v874_v21  ;;  %v290_v21 = vsub.s32 1, %v1168_v34 }
  0x58   :  { %790 = vmatprep.subr.bf16.mxu0 %v1077_v3 }
  0x5b   :  { %791 = vmatpush3.bf16.msra.mxu0 %v875_v22  ;;  %v291_v22 = vrot.slane %v1174_v36, %v290_v21 }
  0x5c   :  { %816 = vmatprep.subr.bf16.mxu0 %v1077_v3 }
  0xc7   :  { %v97_v7 = vpop.xlane.xlu0 %96 }
  0xc8   :  { %v100_v8 = vmul.f32 0.03125, %v97_v7  ;;  %v881_v7 = vld [vmem:[#allocation7 + $0x10] sm:$0xff]  }
  0xc9   :  { %807 = vmatpush3.bf16.msra.mxu1 %v881_v7 }
  0xca   :  { %v102_v9 = vsub.f32 %v94_v0, %v100_v8  ;;  %v882_v8 = vld [vmem:[#allocation7 + $0x8] sm:$0xff]   ;;  %808 = vmatprep.subr.bf16.mxu1 %v1077_v3 }
  0xcb   :  { %v99_v10 = vpop.xlane.xlu0 %98 }
  0xcc   :  { %v101_v11 = vmul.f32 0.03125, %v99_v10  ;;  %v107_v12 = vsel %vm106_vm0, %v102_v9, 0.0  ;;  %v883_v9 = vld [vmem:[#allocation7] sm:$0xff]  }
  0xcd   :  { %v109_v13 = vmul.f32 %v107_v12, %v107_v12  ;;  %809 = vmatpush3.bf16.msra.mxu1 %v882_v8 }
  0xce   :  { %v103_v14 = vsub.f32 %v95_v1, %v101_v11  ;;  %810 = vmatprep.subr.bf16.mxu1 %v1077_v3 }
  0xcf   :  { %111 = vadd.xlane.f32.xlu1 %v109_v13 }
  0xd0   :  { %v108_v15 = vsel %vm106_vm0, %v103_v14, 0.0 }
  0xd1   :  { %v110_v16 = vmul.f32 %v108_v15, %v108_v15  ;;  %811 = vmatpush3.bf16.msra.mxu1 %v883_v9 }
  0xd2   :  { %836 = vmatprep.subr.bf16.mxu1 %v1077_v3 }
  0xd3   :  { %113 = vadd.xlane.f32.xlu1 %v110_v16 }
 0x158   :  { %v112_v23 = vpop.xlane.xlu1 %111 }
 0x159   :  { %v115_v24 = vmul.f32 0.03125, %v112_v23 }
 0x15b   :  { %v117_v25 = vadd.f32 1e-05, %v115_v24 }
 0x15c   :  { %v114_v26 = vpop.xlane.xlu1 %113 }
 0x15d   :  { %v116_v27 = vmul.f32 0.03125, %v114_v26  ;;  %900 = vrsqrt.f32 %v117_v25 }
 0x15f   :  { %v118_v28 = vadd.f32 1e-05, %v116_v27 }
 0x161   :  { %902 = vrsqrt.f32 %v118_v28 }
 0x16a   :  { %v901_v29 = vpop.eup %900 }
 0x16b   :  { %v121_v31 = vmul.f32 %v901_v29, %v107_v12 }
 0x16e   :  { %v903_v30 = vpop.eup %902 }
 0x16f   :  { %v122_v32 = vmul.f32 %v903_v30, %v108_v15 }
 0x171   :  { %v123_v33 = vpack.c.bf16 %v122_v32, %v121_v31 }
 0x173   :  { %793 = vmatmul.mubr.bf16.vlgmr.msra.gmra.mxu0 %v123_v33 }
 0x174   :  { %832 = vmatprep.mubr.msk.bf16.mxu0 %vm1078_vm1, %v1077_v3 }
 0x233   :  { %v226_v38 = vpop.f32.mrf.mxu0 }
 0x234   :  { %v227_v39 = vadd.f32 %v226_v38, %v143_v37 }
 0x235   :  { %v794_v40 = vpop.f32.mrf.mxu0 }
 0x236   :  { %v710_v41 = vmul.f32 -1.442695, %v227_v39 }
 0x237   :  { %v229_v42 = vpop.f32.mrf.mxu0 }
 0x238   :  { %904 = vpow2.f32 %v710_v41  ;;  %v230_v43 = vadd.f32 %v229_v42, %v143_v37 }
 0x239   :  { %v795_v44 = vpop.f32.mrf.mxu0 }
 0x23a   :  { %v711_v45 = vmul.f32 -1.442695, %v230_v43  ;;  %v885_v44 = vld [vmem:[#allocation8 + $0x30] sm:$0xff]  }
 0x23c   :  { %906 = vpow2.f32 %v711_v45 }
 0x245   :  { %v905_v46 = vpop.eup %904 }
 0x246   :  { %v239_v47 = vadd.f32 1.0, %v905_v46 }
 0x248   :  { %908 = vrcp.f32 %v239_v47 }
 0x249   :  { %v907_v48 = vpop.eup %906 }
 0x24a   :  { %v240_v49 = vadd.f32 1.0, %v907_v48 }
 0x24c   :  { %910 = vrcp.f32 %v240_v49 }
 0x255   :  { %v909_v50 = vpop.eup %908 }
 0x256   :  { %v1177_v51 = vmul.f32 %v909_v50, %v227_v39 }
 0x258   :  { %247 = vadd.xlane.f32.xlu0 %v1177_v51 }
 0x259   :  { %v911_v52 = vpop.eup %910 }
 0x25a   :  { %v1180_v53 = vmul.f32 %v911_v52, %v230_v43  ;;  %v884_v43 = vld [vmem:[#allocation8 + $0x38] sm:$0xff]  }
 0x25b   :  { %817 = vmatpush3.bf16.msra.mxu0 %v884_v43 }
 0x25c   :  { %249 = vadd.xlane.f32.xlu1 %v1180_v53  ;;  %818 = vmatprep.subr.bf16.mxu0 %v1077_v3 }
 0x25f   :  { %819 = vmatpush3.bf16.msra.mxu0 %v885_v44  ;;  %v894_v44 = vld [vmem:[#allocation10 + $0x28] sm:$0xff]  }
 0x260   :  { %820 = vmatprep.subr.bf16.mxu0 %v1077_v3 }
 0x263   :  { %821 = vmatpush3.bf16.msra.mxu0 %v886_v55 }
 0x264   :  { %822 = vmatprep.subr.bf16.mxu0 %v1077_v3 }
 0x2e1   :  { %v248_v56 = vpop.xlane.xlu0 %247 }
 0x2e2   :  { %v251_v57 = vmul.f32 0.03125, %v248_v56  ;;  %v887_v56 = vld [vmem:[#allocation8 + $0x20] sm:$0xff]  }
 0x2e3   :  { %823 = vmatpush3.bf16.msra.mxu0 %v887_v56 }
 0x2e4   :  { %v253_v58 = vsub.f32 %v1177_v51, %v251_v57  ;;  %824 = vmatprep.subr.bf16.mxu0 %v1077_v3  ;;  %v888_v57 = vld [vmem:[#allocation8 + $0x18] sm:$0xff]  }
 0x2e5   :  { %v250_v59 = vpop.xlane.xlu1 %249 }
 0x2e6   :  { %v252_v60 = vmul.f32 0.03125, %v250_v59  ;;  %v255_v61 = vsel %vm106_vm0, %v253_v58, 0.0  ;;  %v889_v58 = vld [vmem:[#allocation8 + $0x10] sm:$0xff]   ;;  %v890_v59 = vld [vmem:[#allocation8 + $0x8] sm:$0xff]  }
 0x2e7   :  { %v257_v62 = vmul.f32 %v255_v61, %v255_v61  ;;  %825 = vmatpush3.bf16.msra.mxu0 %v888_v57 }
 0x2e8   :  { %v254_v63 = vsub.f32 %v1180_v53, %v252_v60  ;;  %826 = vmatprep.subr.bf16.mxu0 %v1077_v3  ;;  %v891_v60 = vld [vmem:[#allocation8] sm:$0xff]  }
 0x2e9   :  { %259 = vadd.xlane.f32.xlu0 %v257_v62 }
 0x2ea   :  { %v256_v0 = vsel %vm106_vm0, %v254_v63, 0.0 }
 0x2eb   :  { %v258_v1 = vmul.f32 %v256_v0, %v256_v0  ;;  %827 = vmatpush3.bf16.msra.mxu0 %v889_v58 }
 0x2ec   :  { %828 = vmatprep.subr.bf16.mxu0 %v1077_v3 }
 0x2ed   :  { %261 = vadd.xlane.f32.xlu1 %v258_v1 }
 0x2ef   :  { %829 = vmatpush3.bf16.msra.mxu0 %v890_v59 }
 0x2f0   :  { %830 = vmatprep.subr.bf16.mxu0 %v1077_v3 }
 0x2f3   :  { %831 = vmatpush3.bf16.msra.mxu0 %v891_v60  ;;  %v590_v60 = vsub.s32 3, %v1168_v34 }
 0x372   :  { %v260_v10 = vpop.xlane.xlu0 %259 }
 0x373   :  { %v263_v11 = vmul.f32 0.03125, %v260_v10  ;;  %v440_v10 = vsub.s32 2, %v1168_v34 }
 0x375   :  { %v265_v12 = vadd.f32 1e-05, %v263_v11  ;;  %v441_v11 = vrot.slane %v1174_v36, %v440_v10 }
 0x376   :  { %v262_v13 = vpop.xlane.xlu1 %261 }
 0x377   :  { %v264_v14 = vmul.f32 0.03125, %v262_v13  ;;  %912 = vrsqrt.f32 %v265_v12 }
 0x379   :  { %v266_v15 = vadd.f32 1e-05, %v264_v14 }
 0x37b   :  { %914 = vrsqrt.f32 %v266_v15 }
 0x384   :  { %v913_v16 = vpop.eup %912 }
 0x385   :  { %v269_v18 = vmul.f32 %v913_v16, %v255_v61 }
 0x388   :  { %v915_v17 = vpop.eup %914 }
 0x389   :  { %v270_v19 = vmul.f32 %v915_v17, %v256_v0 }
 0x38b   :  { %v271_v20 = vpack.c.bf16 %v270_v19, %v269_v18 }
 0x38d   :  { %813 = vmatmul.mubr.bf16.vlgmr.msra.gmra.mxu1 %v271_v20 }
 0x38e   :  { %852 = vmatprep.mubr.msk.bf16.mxu1 %vm1078_vm1, %v1077_v3 }
 0x44d   :  { %v374_v23 = vpop.f32.mrf.mxu1 }
 0x44e   :  { %v375_v24 = vadd.f32 %v374_v23, %v291_v22 }
 0x44f   :  { %v814_v25 = vpop.f32.mrf.mxu1 }
 0x450   :  { %v720_v26 = vmul.f32 -1.442695, %v375_v24 }
 0x451   :  { %v377_v27 = vpop.f32.mrf.mxu1 }
 0x452   :  { %916 = vpow2.f32 %v720_v26  ;;  %v378_v28 = vadd.f32 %v377_v27, %v291_v22 }
 0x453   :  { %v815_v29 = vpop.f32.mrf.mxu1 }
 0x454   :  { %v721_v30 = vmul.f32 -1.442695, %v378_v28 }
 0x456   :  { %918 = vpow2.f32 %v721_v30  ;;  %v892_v30 = vld [vmem:[#allocation10 + $0x38] sm:$0xff]  }
 0x457   :  { %837 = vmatpush3.bf16.msra.mxu1 %v892_v30 }
 0x458   :  { %838 = vmatprep.subr.bf16.mxu1 %v1077_v3 }
 0x45f   :  { %v917_v31 = vpop.eup %916 }
 0x460   :  { %v387_v32 = vadd.f32 1.0, %v917_v31  ;;  %v893_v31 = vld [vmem:[#allocation10 + $0x30] sm:$0xff]  }
 0x461   :  { %839 = vmatpush3.bf16.msra.mxu1 %v893_v31 }
 0x462   :  { %920 = vrcp.f32 %v387_v32  ;;  %840 = vmatprep.subr.bf16.mxu1 %v1077_v3 }
 0x463   :  { %v919_v33 = vpop.eup %918 }
 0x464   :  { %v388_v35 = vadd.f32 1.0, %v919_v33 }
 0x465   :  { %841 = vmatpush3.bf16.msra.mxu1 %v894_v44 }
 0x466   :  { %922 = vrcp.f32 %v388_v35  ;;  %842 = vmatprep.subr.bf16.mxu1 %v1077_v3 }
 0x46f   :  { %v921_v37 = vpop.eup %920 }
 0x470   :  { %v393_v38 = vmul.f32 %v921_v37, %v375_v24 }
 0x472   :  { %v1202_v39 = vadd.f32 %v393_v38, %v1177_v51 }
 0x473   :  { %v923_v40 = vpop.eup %922 }
 0x474   :  { %v394_v41 = vmul.f32 %v923_v40, %v378_v28  ;;  %397 = vadd.xlane.f32.xlu0 %v1202_v39 }
 0x476   :  { %v1206_v42 = vadd.f32 %v394_v41, %v1180_v53 }
 0x478   :  { %399 = vadd.xlane.f32.xlu1 %v1206_v42 }
 0x4fd   :  { %v398_v45 = vpop.xlane.xlu0 %397 }
 0x4fe   :  { %v401_v46 = vmul.f32 0.03125, %v398_v45  ;;  %v895_v45 = vld [vmem:[#allocation10 + $0x20] sm:$0xff]  }
 0x4ff   :  { %843 = vmatpush3.bf16.msra.mxu1 %v895_v45 }
 0x500   :  { %v403_v47 = vsub.f32 %v1202_v39, %v401_v46  ;;  %844 = vmatprep.subr.bf16.mxu1 %v1077_v3  ;;  %v896_v46 = vld [vmem:[#allocation10 + $0x18] sm:$0xff]  }
 0x501   :  { %v400_v48 = vpop.xlane.xlu1 %399 }
 0x502   :  { %v402_v49 = vmul.f32 0.03125, %v400_v48  ;;  %v405_v50 = vsel %vm106_vm0, %v403_v47, 0.0  ;;  %v897_v47 = vld [vmem:[#allocation10 + $0x10] sm:$0xff]   ;;  %v898_v48 = vld [vmem:[#allocation10 + $0x8] sm:$0xff]  }
 0x503   :  { %v407_v51 = vmul.f32 %v405_v50, %v405_v50  ;;  %845 = vmatpush3.bf16.msra.mxu1 %v896_v46 }
 0x504   :  { %v404_v52 = vsub.f32 %v1206_v42, %v402_v49  ;;  %846 = vmatprep.subr.bf16.mxu1 %v1077_v3 }
 0x505   :  { %409 = vadd.xlane.f32.xlu0 %v407_v51 }
 0x506   :  { %v406_v53 = vsel %vm106_vm0, %v404_v52, 0.0 }
 0x507   :  { %v408_v54 = vmul.f32 %v406_v53, %v406_v53  ;;  %847 = vmatpush3.bf16.msra.mxu1 %v897_v47 }
 0x508   :  { %848 = vmatprep.subr.bf16.mxu1 %v1077_v3 }
 0x509   :  { %411 = vadd.xlane.f32.xlu1 %v408_v54 }
 0x50b   :  { %849 = vmatpush3.bf16.msra.mxu1 %v898_v48 }
 0x50c   :  { %850 = vmatprep.subr.bf16.mxu1 %v1077_v3 }
 0x50f   :  { %851 = vmatpush3.bf16.msra.mxu1 %v899_v6 }
 0x58e   :  { %v410_v61 = vpop.xlane.xlu0 %409 }
 0x58f   :  { %v413_v62 = vmul.f32 0.03125, %v410_v61  ;;  %v591_v61 = vrot.slane %v1174_v36, %v590_v60 }
 0x591   :  { %v415_v63 = vadd.f32 1e-05, %v413_v62 }
 0x592   :  { %v412_v0 = vpop.xlane.xlu1 %411 }
 0x593   :  { %v414_v1 = vmul.f32 0.03125, %v412_v0  ;;  %924 = vrsqrt.f32 %v415_v63 }
 0x595   :  { %v416_v2 = vadd.f32 1e-05, %v414_v1 }
 0x597   :  { %926 = vrsqrt.f32 %v416_v2 }
 0x5a0   :  { %v925_v4 = vpop.eup %924 }
 0x5a1   :  { %v419_v7 = vmul.f32 %v925_v4, %v405_v50 }
 0x5a4   :  { %v927_v5 = vpop.eup %926 }
 0x5a5   :  { %v420_v8 = vmul.f32 %v927_v5, %v406_v53 }
 0x5a7   :  { %v421_v9 = vpack.c.bf16 %v420_v8, %v419_v7 }
 0x5a9   :  { %833 = vmatmul.mubr.bf16.vlgmr.msra.gmra.mxu0 %v421_v9 }
 0x669   :  { %v524_v12 = vpop.f32.mrf.mxu0 }
 0x66a   :  { %v525_v13 = vadd.f32 %v524_v12, %v441_v11 }
 0x66b   :  { %v834_v14 = vpop.f32.mrf.mxu0 }
 0x66c   :  { %v730_v15 = vmul.f32 -1.442695, %v525_v13 }
 0x66d   :  { %v527_v16 = vpop.f32.mrf.mxu0 }
 0x66e   :  { %928 = vpow2.f32 %v730_v15  ;;  %v528_v17 = vadd.f32 %v527_v16, %v441_v11 }
 0x66f   :  { %v835_v18 = vpop.f32.mrf.mxu0 }
 0x670   :  { %v731_v19 = vmul.f32 -1.442695, %v528_v17 }
 0x672   :  { %930 = vpow2.f32 %v731_v19 }
 0x67b   :  { %v929_v20 = vpop.eup %928 }
 0x67c   :  { %v537_v21 = vadd.f32 1.0, %v929_v20 }
 0x67e   :  { %932 = vrcp.f32 %v537_v21 }
 0x67f   :  { %v931_v22 = vpop.eup %930 }
 0x680   :  { %v538_v23 = vadd.f32 1.0, %v931_v22 }
 0x682   :  { %934 = vrcp.f32 %v538_v23 }
 0x68b   :  { %v933_v24 = vpop.eup %932 }
 0x68c   :  { %v543_v25 = vmul.f32 %v933_v24, %v525_v13 }
 0x68e   :  { %v545_v26 = vadd.f32 %v543_v25, %v1202_v39 }
 0x68f   :  { %v935_v27 = vpop.eup %934 }
 0x690   :  { %v544_v28 = vmul.f32 %v935_v27, %v528_v17  ;;  %547 = vadd.xlane.f32.xlu0 %v545_v26 }
 0x692   :  { %v546_v29 = vadd.f32 %v544_v28, %v1206_v42 }
 0x694   :  { %549 = vadd.xlane.f32.xlu1 %v546_v29 }
 0x719   :  { %v548_v32 = vpop.xlane.xlu0 %547 }
 0x71a   :  { %v551_v33 = vmul.f32 0.03125, %v548_v32 }
 0x71c   :  { %v553_v35 = vsub.f32 %v545_v26, %v551_v33 }
 0x71d   :  { %v550_v37 = vpop.xlane.xlu1 %549 }
 0x71e   :  { %v552_v38 = vmul.f32 0.03125, %v550_v37  ;;  %v555_v39 = vsel %vm106_vm0, %v553_v35, 0.0 }
 0x71f   :  { %v557_v40 = vmul.f32 %v555_v39, %v555_v39 }
 0x720   :  { %v554_v41 = vsub.f32 %v546_v29, %v552_v38 }
 0x721   :  { %559 = vadd.xlane.f32.xlu0 %v557_v40 }
 0x722   :  { %v556_v42 = vsel %vm106_vm0, %v554_v41, 0.0 }
 0x723   :  { %v558_v43 = vmul.f32 %v556_v42, %v556_v42 }
 0x725   :  { %561 = vadd.xlane.f32.xlu1 %v558_v43 }
 0x7aa   :  { %v560_v49 = vpop.xlane.xlu0 %559 }
 0x7ab   :  { %v563_v50 = vmul.f32 0.03125, %v560_v49 }
 0x7ad   :  { %v565_v51 = vadd.f32 1e-05, %v563_v50 }
 0x7ae   :  { %v562_v52 = vpop.xlane.xlu1 %561 }
 0x7af   :  { %v564_v53 = vmul.f32 0.03125, %v562_v52  ;;  %936 = vrsqrt.f32 %v565_v51 }
 0x7b1   :  { %v566_v54 = vadd.f32 1e-05, %v564_v53 }
 0x7b3   :  { %938 = vrsqrt.f32 %v566_v54 }
 0x7bc   :  { %v937_v55 = vpop.eup %936 }
 0x7bd   :  { %v569_v57 = vmul.f32 %v937_v55, %v555_v39 }
 0x7c0   :  { %v939_v56 = vpop.eup %938 }
 0x7c1   :  { %v570_v58 = vmul.f32 %v939_v56, %v556_v42 }
 0x7c3   :  { %v571_v59 = vpack.c.bf16 %v570_v58, %v569_v57 }
 0x7c5   :  { %853 = vmatmul.mubr.bf16.vlgmr.msra.gmra.mxu1 %v571_v59 }
 0x885   :  { %v674_v3 = vpop.f32.mrf.mxu1 }
 0x886   :  { %v675_v62 = vadd.f32 %v674_v3, %v591_v61 }
 0x887   :  { %v854_v63 = vpop.f32.mrf.mxu1 }
 0x888   :  { %681 = vst [vmem:[#allocation11] sm:$0xff] %v675_v62 }
 0x889   :  { %v677_v0 = vpop.f32.mrf.mxu1 }
 0x88a   :  { %v678_v1 = vadd.f32 %v677_v0, %v591_v61 }
 0x88b   :  { %v855_v2 = vpop.f32.mrf.mxu1 }
 0x88c   :  { %682 = vst [vmem:[#allocation11 + $0x8] sm:$0xff] %v678_v1 }
 0x88d   :  { %1051 = shalt.err (!%p1048_p1)
}
 0x88e   :  { %694 = dma.vmem_to_hbm [thread:$0]  %s689_s23, 256, %s1251_s6, [#allocation4], %s1073_s11, %s1073_s11, %s1074_s12  }
 0x88f   :  { %1066 = dma.done.wait [#allocation4], 256  }
 0x890   :  { %1067 = vsyncadd [#allocation4], 4294967040 }
 0x891   :  { %698 = vsyncpa [#allocation3], 1 }
 0x892   :  { %699 = vsyncpa [#allocation6], 1 }
 0x893   :  { %700 = vsyncpa [#allocation9], 1 }
 0x894   :  { %701 = vsyncpa [#allocation4], 1 }

// kernel: tpu_custom_call.1
= control target key start
LH: loop header
LB: loop body
LE: loop exit
PB: predicated region body
PF: predicated region fallthrough
CT: control target
= control target key end

     0   :  { %11 = vsyncpa [#allocation3], 0  ;;  %s1245_s0 = inlined_call_operand.hbm [shape: f32[16,128], index: 0, kind: input, shape index: {}]   ;;  %s1246_s1 = inlined_call_operand.hbm [shape: bf16[128,128], index: 1, kind: input, shape index: {}]   ;;  %s1247_s2 = inlined_call_operand.hbm [shape: bf16[128,128], index: 2, kind: input, shape index: {}]   ;;  %s1248_s3 = inlined_call_operand.hbm [shape: bf16[128,128], index: 3, kind: input, shape index: {}]   ;;  %s1249_s4 = inlined_call_operand.hbm [shape: bf16[128,128], index: 4, kind: input, shape index: {}]   ;;  %s1250_s5 = inlined_call_operand.vmem [shape: f32[8,128], index: 5, kind: input, shape index: {}]   ;;  %s1251_s6 = inlined_call_operand.hbm [shape: f32[16,128], index: 6, kind: output, shape index: {}]  }
   0x1   :  { %12 = vsyncpa [#allocation6], 0 }
   0x2   :  { %13 = vsyncpa [#allocation9], 0 }
   0x3   :  { %14 = vsyncpa [#allocation4], 0  ;;  %s1068_s21 = smov [#allocation5]  }
   0x4   :  { %s32_s22 = sshll.u32 %s1068_s21, 4  ;;  %s33_s22 = int_to_ptr.vmem [resolvable:$true] %s32_s22 }
   0x5   :  { %s948_s23 = scalar_lea.vmem %s33_s22, 1024  ;;  %p953_p1 = scmp.lt.s32.totalorder %s33_s22, %s33_s22 }
   0x6   :  { %p949_p0 = scmp.ne.s32.totalorder %s33_s22, %s948_s23  ;;  %p954_p2 = scmp.lt.s32.totalorder %s948_s23, %s948_s23 }
   0x8   :  { %p955_p3 = por %p954_p2, %p953_p1 }
   0xa   :  { %p956_p4 = pnand %p955_p3, %p949_p0 }
   0xc   :  { %959 = shalt.err (!%p956_p4)
}
   0xd   :  { %s1069_s24 = smov 64   ;;  %s1070_s25 = smov 4  }
   0xe   :  { %38 = dma.hbm_to_vmem [thread:$0]  %s1246_s1, 1024, %s33_s22, [#allocation6], %s1069_s24, %s1069_s24, %s1070_s25  }
   0xf   :  { %s1071_s28 = smov [#allocation8]   ;;  %s1072_s30 = smov [#allocation2]  }
  0x10   :  { %s56_s29 = sshll.u32 %s1071_s28, 4  ;;  %s20_s7 = sshll.u32 %s1072_s30, 4  ;;  %s57_s29 = int_to_ptr.vmem [resolvable:$true] %s56_s29  ;;  %s21_s7 = int_to_ptr.vmem [resolvable:$true] %s20_s7 }
  0x11   :  { %s968_s8 = scalar_lea.vmem %s57_s29, 1024  ;;  %p973_p6 = scmp.lt.s32.totalorder %s57_s29, %s57_s29 }
  0x12   :  { %p969_p5 = scmp.ne.s32.totalorder %s57_s29, %s968_s8  ;;  %p974_p7 = scmp.lt.s32.totalorder %s968_s8, %s968_s8 }
  0x14   :  { %p975_p8 = por %p974_p7, %p973_p6 }
  0x16   :  { %p976_p9 = pnand %p975_p8, %p969_p5 }
  0x18   :  { %979 = shalt.err (!%p976_p9)
}
  0x19   :  { %62 = dma.hbm_to_vmem [thread:$0]  %s1248_s3, 1024, %s57_s29, [#allocation9], %s1069_s24, %s1069_s24, %s1070_s25  }
  0x1a   :  { %s988_s1 = scalar_lea.vmem %s21_s7, 256  ;;  %p993_p11 = scmp.lt.s32.totalorder %s21_s7, %s21_s7 }
  0x1b   :  { %p989_p10 = scmp.ne.s32.totalorder %s21_s7, %s988_s1  ;;  %p994_p12 = scmp.lt.s32.totalorder %s988_s1, %s988_s1 }
  0x1d   :  { %p995_p13 = por %p994_p12, %p993_p11 }
  0x1f   :  { %p996_p0 = pnand %p995_p13, %p989_p10 }
  0x21   :  { %999 = shalt.err (!%p996_p0)
}
  0x22   :  { %s1073_s11 = smov 128   ;;  %s1074_s12 = smov 8  }
  0x23   :  { %26 = dma.hbm_to_vmem [thread:$0]  %s1245_s0, 256, %s21_s7, [#allocation3], %s1073_s11, %s1073_s11, %s1074_s12  }
  0x24   :  { %s1075_s15 = smov [#allocation7]   ;;  %s1076_s3 = smov [#allocation10]  }
  0x25   :  { %s44_s16 = sshll.u32 %s1075_s15, 4  ;;  %s68_s17 = sshll.u32 %s1076_s3, 4  ;;  %s45_s16 = int_to_ptr.vmem [resolvable:$true] %s44_s16  ;;  %s69_s17 = int_to_ptr.vmem [resolvable:$true] %s68_s17 }
  0x26   :  { %s1008_s18 = scalar_lea.vmem %s45_s16, 1024  ;;  %p1013_p2 = scmp.lt.s32.totalorder %s45_s16, %s45_s16 }
  0x27   :  { %p1009_p1 = scmp.ne.s32.totalorder %s45_s16, %s1008_s18  ;;  %p1014_p3 = scmp.lt.s32.totalorder %s1008_s18, %s1008_s18 }
  0x29   :  { %p1015_p4 = por %p1014_p3, %p1013_p2 }
  0x2b   :  { %p1016_p5 = pnand %p1015_p4, %p1009_p1 }
  0x2d   :  { %1019 = shalt.err (!%p1016_p5)
}
  0x2e   :  { %50 = dma.hbm_to_vmem [thread:$0]  %s1247_s2, 1024, %s45_s16, [#allocation6], %s1069_s24, %s1069_s24, %s1070_s25  }
  0x2f   :  { %s1028_s0 = scalar_lea.vmem %s69_s17, 1024  ;;  %p1033_p7 = scmp.lt.s32.totalorder %s69_s17, %s69_s17 }
  0x30   :  { %p1029_p6 = scmp.ne.s32.totalorder %s69_s17, %s1028_s0  ;;  %p1034_p8 = scmp.lt.s32.totalorder %s1028_s0, %s1028_s0 }
  0x32   :  { %p1035_p9 = por %p1034_p8, %p1033_p7 }
  0x34   :  { %p1036_p10 = pnand %p1035_p9, %p1029_p6 }
  0x36   :  { %1039 = shalt.err (!%p1036_p10)
}
  0x37   :  { %74 = dma.hbm_to_vmem [thread:$0]  %s1249_s4, 1024, %s69_s17, [#allocation9], %s1069_s24, %s1069_s24, %s1070_s25  }
  0x38   :  { %1060 = dma.done.wait [#allocation3], 256  }
  0x39   :  { %1061 = vsyncadd [#allocation3], 4294967040 }
  0x3a   :  { %1062 = dma.done.wait [#allocation6], 2048  }
  0x3b   :  { %1063 = vsyncadd [#allocation6], 4294965248 }
  0x3c   :  { %1064 = dma.done.wait [#allocation9], 2048  }
  0x3d   :  { %1065 = vsyncadd [#allocation9], 4294965248  ;;  %v94_v0 = vld [vmem:[#allocation2] sm:$0xff]  ;;  %v95_v1 = vld [vmem:[#allocation2 + $0x8] sm:$0xff]  ;;  %v1077_v3 = vmov 0.0   ;;  %v104_v5 = vlaneseq  ;;  %vm1078_vm1 = vmmov 0  }
  0x3e   :  { %96 = vadd.xlane.f32.xlu0 %v94_v0  ;;  %v868_v2 = vld [vmem:[#allocation5 + $0x38] sm:$0xff]   ;;  %776 = vmatprep.subr.bf16.mxu0 %v1077_v3  ;;  %v869_v4 = vld [vmem:[#allocation5 + $0x30] sm:$0xff]   ;;  %v870_v17 = vld [vmem:[#allocation5 + $0x28] sm:$0xff]  }
  0x3f   :  { %796 = vmatprep.subr.bf16.mxu1 %v1077_v3  ;;  %777 = vmatpush3.bf16.msra.mxu0 %v868_v2  ;;  %v1149_v6 = vand.u32 127, %v104_v5  ;;  %v871_v18 = vld [vmem:[#allocation5 + $0x20] sm:$0xff]   ;;  %v872_v19 = vld [vmem:[#allocation5 + $0x18] sm:$0xff]   ;;  %v873_v20 = vld [vmem:[#allocation5 + $0x10] sm:$0xff]   ;;  %v1168_v34 = vshrl.u32 %v104_v5, 7 }
  0x40   :  { %778 = vmatprep.subr.bf16.mxu0 %v1077_v3  ;;  %792 = vmatprep.mubr.msk.bf16.mxu0 %vm1078_vm1, %v1077_v3  ;;  %v874_v21 = vld [vmem:[#allocation5 + $0x8] sm:$0xff]   ;;  %v875_v22 = vld [vmem:[#allocation5] sm:$0xff]   ;;  %v1174_v36 = vld [vmem:[%s1250_s5] sm:$0xff]  ;;  %s1079_s5 = smov [#allocation11]  }
  0x41   :  { %vm106_vm0 = vcmp.lt.s32.totalorder %v1149_v6, 32  ;;  %812 = vmatprep.mubr.msk.bf16.mxu1 %vm1078_vm1, %v1077_v3  ;;  %v142_v35 = vsub.s32 0, %v1168_v34  ;;  %v876_v54 = vld [vmem:[#allocation7 + $0x38] sm:$0xff]   ;;  %v877_v55 = vld [vmem:[#allocation7 + $0x30] sm:$0xff]   ;;  %v878_v2 = vld [vmem:[#allocation7 + $0x28] sm:$0xff]   ;;  %s688_s23 = sshll.u32 %s1079_s5, 4  ;;  %s689_s23 = int_to_ptr.vmem [resolvable:$true] %s688_s23 }
  0x42   :  { %98 = vadd.xlane.f32.xlu0 %v95_v1  ;;  %797 = vmatpush3.bf16.msra.mxu1 %v876_v54  ;;  %v880_v5 = vld [vmem:[#allocation7 + $0x18] sm:$0xff]   ;;  %v899_v6 = vld [vmem:[#allocation10] sm:$0xff]   ;;  %s1040_s24 = scalar_lea.vmem %s689_s23, 256  ;;  %p1045_p12 = scmp.lt.s32.totalorder %s689_s23, %s689_s23 }
  0x43   :  { %779 = vmatpush3.bf16.msra.mxu0 %v869_v4  ;;  %v143_v37 = vrot.slane %v1174_v36, %v142_v35  ;;  %798 = vmatprep.subr.bf16.mxu1 %v1077_v3  ;;  %v879_v4 = vld [vmem:[#allocation7 + $0x20] sm:$0xff]   ;;  %p1041_p11 = scmp.ne.s32.totalorder %s689_s23, %s1040_s24  ;;  %p1046_p13 = scmp.lt.s32.totalorder %s1040_s24, %s1040_s24 }
  0x44   :  { %780 = vmatprep.subr.bf16.mxu0 %v1077_v3 }
  0x45   :  { %p1047_p0 = por %p1046_p13, %p1045_p12 }
  0x46   :  { %799 = vmatpush3.bf16.msra.mxu1 %v877_v55  ;;  %v886_v55 = vld [vmem:[#allocation8 + $0x28] sm:$0xff]  }
  0x47   :  { %781 = vmatpush3.bf16.msra.mxu0 %v870_v17  ;;  %800 = vmatprep.subr.bf16.mxu1 %v1077_v3  ;;  %p1048_p1 = pnand %p1047_p0, %p1041_p11 }
  0x48   :  { %782 = vmatprep.subr.bf16.mxu0 %v1077_v3 }
  0x4a   :  { %801 = vmatpush3.bf16.msra.mxu1 %v878_v2 }
  0x4b   :  { %783 = vmatpush3.bf16.msra.mxu0 %v871_v18  ;;  %802 = vmatprep.subr.bf16.mxu1 %v1077_v3 }
  0x4c   :  { %784 = vmatprep.subr.bf16.mxu0 %v1077_v3 }
  0x4e   :  { %803 = vmatpush3.bf16.msra.mxu1 %v879_v4 }
  0x4f   :  { %785 = vmatpush3.bf16.msra.mxu0 %v872_v19  ;;  %804 = vmatprep.subr.bf16.mxu1 %v1077_v3 }
  0x50   :  { %786 = vmatprep.subr.bf16.mxu0 %v1077_v3 }
  0x52   :  { %805 = vmatpush3.bf16.msra.mxu1 %v880_v5 }
  0x53   :  { %787 = vmatpush3.bf16.msra.mxu0 %v873_v20  ;;  %806 = vmatprep.subr.bf16.mxu1 %v1077_v3 }
  0x54   :  { %788 = vmatprep.subr.bf16.mxu0 %v1077_v3 }
  0x57   :  { %789 = vmatpush3.bf16.msra.mxu0 %v874_v21  ;;  %v290_v21 = vsub.s32 1, %v1168_v34 }
  0x58   :  { %790 = vmatprep.subr.bf16.mxu0 %v1077_v3 }
  0x5b   :  { %791 = vmatpush3.bf16.msra.mxu0 %v875_v22  ;;  %v291_v22 = vrot.slane %v1174_v36, %v290_v21 }
  0x5c   :  { %816 = vmatprep.subr.bf16.mxu0 %v1077_v3 }
  0xc7   :  { %v97_v7 = vpop.xlane.xlu0 %96 }
  0xc8   :  { %v100_v8 = vmul.f32 0.03125, %v97_v7  ;;  %v881_v7 = vld [vmem:[#allocation7 + $0x10] sm:$0xff]  }
  0xc9   :  { %807 = vmatpush3.bf16.msra.mxu1 %v881_v7 }
  0xca   :  { %v102_v9 = vsub.f32 %v94_v0, %v100_v8  ;;  %v882_v8 = vld [vmem:[#allocation7 + $0x8] sm:$0xff]   ;;  %808 = vmatprep.subr.bf16.mxu1 %v1077_v3 }
  0xcb   :  { %v99_v10 = vpop.xlane.xlu0 %98 }
  0xcc   :  { %v101_v11 = vmul.f32 0.03125, %v99_v10  ;;  %v107_v12 = vsel %vm106_vm0, %v102_v9, 0.0  ;;  %v883_v9 = vld [vmem:[#allocation7] sm:$0xff]  }
  0xcd   :  { %v109_v13 = vmul.f32 %v107_v12, %v107_v12  ;;  %809 = vmatpush3.bf16.msra.mxu1 %v882_v8 }
  0xce   :  { %v103_v14 = vsub.f32 %v95_v1, %v101_v11  ;;  %810 = vmatprep.subr.bf16.mxu1 %v1077_v3 }
  0xcf   :  { %111 = vadd.xlane.f32.xlu1 %v109_v13 }
  0xd0   :  { %v108_v15 = vsel %vm106_vm0, %v103_v14, 0.0 }
  0xd1   :  { %v110_v16 = vmul.f32 %v108_v15, %v108_v15  ;;  %811 = vmatpush3.bf16.msra.mxu1 %v883_v9 }
  0xd2   :  { %836 = vmatprep.subr.bf16.mxu1 %v1077_v3 }
  0xd3   :  { %113 = vadd.xlane.f32.xlu1 %v110_v16 }
 0x158   :  { %v112_v23 = vpop.xlane.xlu1 %111 }
 0x159   :  { %v115_v24 = vmul.f32 0.03125, %v112_v23 }
 0x15b   :  { %v117_v25 = vadd.f32 1e-05, %v115_v24 }
 0x15c   :  { %v114_v26 = vpop.xlane.xlu1 %113 }
 0x15d   :  { %v116_v27 = vmul.f32 0.03125, %v114_v26  ;;  %900 = vrsqrt.f32 %v117_v25 }
 0x15f   :  { %v118_v28 = vadd.f32 1e-05, %v116_v27 }
 0x161   :  { %902 = vrsqrt.f32 %v118_v28 }
 0x16a   :  { %v901_v29 = vpop.eup %900 }
 0x16b   :  { %v121_v31 = vmul.f32 %v901_v29, %v107_v12 }
 0x16e   :  { %v903_v30 = vpop.eup %902 }
 0x16f   :  { %v122_v32 = vmul.f32 %v903_v30, %v108_v15 }
 0x171   :  { %v123_v33 = vpack.c.bf16 %v122_v32, %v121_v31 }
 0x173   :  { %793 = vmatmul.mubr.bf16.vlgmr.msra.gmra.mxu0 %v123_v33 }
 0x174   :  { %832 = vmatprep.mubr.msk.bf16.mxu0 %vm1078_vm1, %v1077_v3 }
 0x233   :  { %v226_v38 = vpop.f32.mrf.mxu0 }
 0x234   :  { %v227_v39 = vadd.f32 %v226_v38, %v143_v37 }
 0x235   :  { %v794_v40 = vpop.f32.mrf.mxu0 }
 0x236   :  { %v710_v41 = vmul.f32 -1.442695, %v227_v39 }
 0x237   :  { %v229_v42 = vpop.f32.mrf.mxu0 }
 0x238   :  { %904 = vpow2.f32 %v710_v41  ;;  %v230_v43 = vadd.f32 %v229_v42, %v143_v37 }
 0x239   :  { %v795_v44 = vpop.f32.mrf.mxu0 }
 0x23a   :  { %v711_v45 = vmul.f32 -1.442695, %v230_v43  ;;  %v885_v44 = vld [vmem:[#allocation8 + $0x30] sm:$0xff]  }
 0x23c   :  { %906 = vpow2.f32 %v711_v45 }
 0x245   :  { %v905_v46 = vpop.eup %904 }
 0x246   :  { %v239_v47 = vadd.f32 1.0, %v905_v46 }
 0x248   :  { %908 = vrcp.f32 %v239_v47 }
 0x249   :  { %v907_v48 = vpop.eup %906 }
 0x24a   :  { %v240_v49 = vadd.f32 1.0, %v907_v48 }
 0x24c   :  { %910 = vrcp.f32 %v240_v49 }
 0x255   :  { %v909_v50 = vpop.eup %908 }
 0x256   :  { %v1177_v51 = vmul.f32 %v909_v50, %v227_v39 }
 0x258   :  { %247 = vadd.xlane.f32.xlu0 %v1177_v51 }
 0x259   :  { %v911_v52 = vpop.eup %910 }
 0x25a   :  { %v1180_v53 = vmul.f32 %v911_v52, %v230_v43  ;;  %v884_v43 = vld [vmem:[#allocation8 + $0x38] sm:$0xff]  }
 0x25b   :  { %817 = vmatpush3.bf16.msra.mxu0 %v884_v43 }
 0x25c   :  { %249 = vadd.xlane.f32.xlu1 %v1180_v53  ;;  %818 = vmatprep.subr.bf16.mxu0 %v1077_v3 }
 0x25f   :  { %819 = vmatpush3.bf16.msra.mxu0 %v885_v44  ;;  %v894_v44 = vld [vmem:[#allocation10 + $0x28] sm:$0xff]  }
 0x260   :  { %820 = vmatprep.subr.bf16.mxu0 %v1077_v3 }
 0x263   :  { %821 = vmatpush3.bf16.msra.mxu0 %v886_v55 }
 0x264   :  { %822 = vmatprep.subr.bf16.mxu0 %v1077_v3 }
 0x2e1   :  { %v248_v56 = vpop.xlane.xlu0 %247 }
 0x2e2   :  { %v251_v57 = vmul.f32 0.03125, %v248_v56  ;;  %v887_v56 = vld [vmem:[#allocation8 + $0x20] sm:$0xff]  }
 0x2e3   :  { %823 = vmatpush3.bf16.msra.mxu0 %v887_v56 }
 0x2e4   :  { %v253_v58 = vsub.f32 %v1177_v51, %v251_v57  ;;  %824 = vmatprep.subr.bf16.mxu0 %v1077_v3  ;;  %v888_v57 = vld [vmem:[#allocation8 + $0x18] sm:$0xff]  }
 0x2e5   :  { %v250_v59 = vpop.xlane.xlu1 %249 }
 0x2e6   :  { %v252_v60 = vmul.f32 0.03125, %v250_v59  ;;  %v255_v61 = vsel %vm106_vm0, %v253_v58, 0.0  ;;  %v889_v58 = vld [vmem:[#allocation8 + $0x10] sm:$0xff]   ;;  %v890_v59 = vld [vmem:[#allocation8 + $0x8] sm:$0xff]  }
 0x2e7   :  { %v257_v62 = vmul.f32 %v255_v61, %v255_v61  ;;  %825 = vmatpush3.bf16.msra.mxu0 %v888_v57 }
 0x2e8   :  { %v254_v63 = vsub.f32 %v1180_v53, %v252_v60  ;;  %826 = vmatprep.subr.bf16.mxu0 %v1077_v3  ;;  %v891_v60 = vld [vmem:[#allocation8] sm:$0xff]  }
 0x2e9   :  { %259 = vadd.xlane.f32.xlu0 %v257_v62 }
 0x2ea   :  { %v256_v0 = vsel %vm106_vm0, %v254_v63, 0.0 }
 0x2eb   :  { %v258_v1 = vmul.f32 %v256_v0, %v256_v0  ;;  %827 = vmatpush3.bf16.msra.mxu0 %v889_v58 }
 0x2ec   :  { %828 = vmatprep.subr.bf16.mxu0 %v1077_v3 }
 0x2ed   :  { %261 = vadd.xlane.f32.xlu1 %v258_v1 }
 0x2ef   :  { %829 = vmatpush3.bf16.msra.mxu0 %v890_v59 }
 0x2f0   :  { %830 = vmatprep.subr.bf16.mxu0 %v1077_v3 }
 0x2f3   :  { %831 = vmatpush3.bf16.msra.mxu0 %v891_v60  ;;  %v590_v60 = vsub.s32 3, %v1168_v34 }
 0x372   :  { %v260_v10 = vpop.xlane.xlu0 %259 }
 0x373   :  { %v263_v11 = vmul.f32 0.03125, %v260_v10  ;;  %v440_v10 = vsub.s32 2, %v1168_v34 }
 0x375   :  { %v265_v12 = vadd.f32 1e-05, %v263_v11  ;;  %v441_v11 = vrot.slane %v1174_v36, %v440_v10 }
 0x376   :  { %v262_v13 = vpop.xlane.xlu1 %261 }
 0x377   :  { %v264_v14 = vmul.f32 0.03125, %v262_v13  ;;  %912 = vrsqrt.f32 %v265_v12 }
 0x379   :  { %v266_v15 = vadd.f32 1e-05, %v264_v14 }
 0x37b   :  { %914 = vrsqrt.f32 %v266_v15 }
 0x384   :  { %v913_v16 = vpop.eup %912 }
 0x385   :  { %v269_v18 = vmul.f32 %v913_v16, %v255_v61 }
 0x388   :  { %v915_v17 = vpop.eup %914 }
 0x389   :  { %v270_v19 = vmul.f32 %v915_v17, %v256_v0 }
 0x38b   :  { %v271_v20 = vpack.c.bf16 %v270_v19, %v269_v18 }
 0x38d   :  { %813 = vmatmul.mubr.bf16.vlgmr.msra.gmra.mxu1 %v271_v20 }
 0x38e   :  { %852 = vmatprep.mubr.msk.bf16.mxu1 %vm1078_vm1, %v1077_v3 }
 0x44d   :  { %v374_v23 = vpop.f32.mrf.mxu1 }
 0x44e   :  { %v375_v24 = vadd.f32 %v374_v23, %v291_v22 }
 0x44f   :  { %v814_v25 = vpop.f32.mrf.mxu1 }
 0x450   :  { %v720_v26 = vmul.f32 -1.442695, %v375_v24 }
 0x451   :  { %v377_v27 = vpop.f32.mrf.mxu1 }
 0x452   :  { %916 = vpow2.f32 %v720_v26  ;;  %v378_v28 = vadd.f32 %v377_v27, %v291_v22 }
 0x453   :  { %v815_v29 = vpop.f32.mrf.mxu1 }
 0x454   :  { %v721_v30 = vmul.f32 -1.442695, %v378_v28 }
 0x456   :  { %918 = vpow2.f32 %v721_v30  ;;  %v892_v30 = vld [vmem:[#allocation10 + $0x38] sm:$0xff]  }
 0x457   :  { %837 = vmatpush3.bf16.msra.mxu1 %v892_v30 }
 0x458   :  { %838 = vmatprep.subr.bf16.mxu1 %v1077_v3 }
 0x45f   :  { %v917_v31 = vpop.eup %916 }
 0x460   :  { %v387_v32 = vadd.f32 1.0, %v917_v31  ;;  %v893_v31 = vld [vmem:[#allocation10 + $0x30] sm:$0xff]  }
 0x461   :  { %839 = vmatpush3.bf16.msra.mxu1 %v893_v31 }
 0x462   :  { %920 = vrcp.f32 %v387_v32  ;;  %840 = vmatprep.subr.bf16.mxu1 %v1077_v3 }
 0x463   :  { %v919_v33 = vpop.eup %918 }
 0x464   :  { %v388_v35 = vadd.f32 1.0, %v919_v33 }
 0x465   :  { %841 = vmatpush3.bf16.msra.mxu1 %v894_v44 }
 0x466   :  { %922 = vrcp.f32 %v388_v35  ;;  %842 = vmatprep.subr.bf16.mxu1 %v1077_v3 }
 0x46f   :  { %v921_v37 = vpop.eup %920 }
 0x470   :  { %v393_v38 = vmul.f32 %v921_v37, %v375_v24 }
 0x472   :  { %v1202_v39 = vadd.f32 %v393_v38, %v1177_v51 }
 0x473   :  { %v923_v40 = vpop.eup %922 }
 0x474   :  { %v394_v41 = vmul.f32 %v923_v40, %v378_v28  ;;  %397 = vadd.xlane.f32.xlu0 %v1202_v39 }
 0x476   :  { %v1206_v42 = vadd.f32 %v394_v41, %v1180_v53 }
 0x478   :  { %399 = vadd.xlane.f32.xlu1 %v1206_v42 }
 0x4fd   :  { %v398_v45 = vpop.xlane.xlu0 %397 }
 0x4fe   :  { %v401_v46 = vmul.f32 0.03125, %v398_v45  ;;  %v895_v45 = vld [vmem:[#allocation10 + $0x20] sm:$0xff]  }
 0x4ff   :  { %843 = vmatpush3.bf16.msra.mxu1 %v895_v45 }
 0x500   :  { %v403_v47 = vsub.f32 %v1202_v39, %v401_v46  ;;  %844 = vmatprep.subr.bf16.mxu1 %v1077_v3  ;;  %v896_v46 = vld [vmem:[#allocation10 + $0x18] sm:$0xff]  }
 0x501   :  { %v400_v48 = vpop.xlane.xlu1 %399 }
 0x502   :  { %v402_v49 = vmul.f32 0.03125, %v400_v48  ;;  %v405_v50 = vsel %vm106_vm0, %v403_v47, 0.0  ;;  %v897_v47 = vld [vmem:[#allocation10 + $0x10] sm:$0xff]   ;;  %v898_v48 = vld [vmem:[#allocation10 + $0x8] sm:$0xff]  }
 0x503   :  { %v407_v51 = vmul.f32 %v405_v50, %v405_v50  ;;  %845 = vmatpush3.bf16.msra.mxu1 %v896_v46 }
 0x504   :  { %v404_v52 = vsub.f32 %v1206_v42, %v402_v49  ;;  %846 = vmatprep.subr.bf16.mxu1 %v1077_v3 }
 0x505   :  { %409 = vadd.xlane.f32.xlu0 %v407_v51 }
 0x506   :  { %v406_v53 = vsel %vm106_vm0, %v404_v52, 0.0 }
 0x507   :  { %v408_v54 = vmul.f32 %v406_v53, %v406_v53  ;;  %847 = vmatpush3.bf16.msra.mxu1 %v897_v47 }
 0x508   :  { %848 = vmatprep.subr.bf16.mxu1 %v1077_v3 }
 0x509   :  { %411 = vadd.xlane.f32.xlu1 %v408_v54 }
 0x50b   :  { %849 = vmatpush3.bf16.msra.mxu1 %v898_v48 }
 0x50c   :  { %850 = vmatprep.subr.bf16.mxu1 %v1077_v3 }
 0x50f   :  { %851 = vmatpush3.bf16.msra.mxu1 %v899_v6 }
 0x58e   :  { %v410_v61 = vpop.xlane.xlu0 %409 }
 0x58f   :  { %v413_v62 = vmul.f32 0.03125, %v410_v61  ;;  %v591_v61 = vrot.slane %v1174_v36, %v590_v60 }
 0x591   :  { %v415_v63 = vadd.f32 1e-05, %v413_v62 }
 0x592   :  { %v412_v0 = vpop.xlane.xlu1 %411 }
 0x593   :  { %v414_v1 = vmul.f32 0.03125, %v412_v0  ;;  %924 = vrsqrt.f32 %v415_v63 }
 0x595   :  { %v416_v2 = vadd.f32 1e-05, %v414_v1 }
 0x597   :  { %926 = vrsqrt.f32 %v416_v2 }
 0x5a0   :  { %v925_v4 = vpop.eup %924 }
 0x5a1   :  { %v419_v7 = vmul.f32 %v925_v4, %v405_v50 }
 0x5a4   :  { %v927_v5 = vpop.eup %926 }
 0x5a5   :  { %v420_v8 = vmul.f32 %v927_v5, %v406_v53 }
 0x5a7   :  { %v421_v9 = vpack.c.bf16 %v420_v8, %v419_v7 }
 0x5a9   :  { %833 = vmatmul.mubr.bf16.vlgmr.msra.gmra.mxu0 %v421_v9 }
 0x669   :  { %v524_v12 = vpop.f32.mrf.mxu0 }
 0x66a   :  { %v525_v13 = vadd.f32 %v524_v12, %v441_v11 }
 0x66b   :  { %v834_v14 = vpop.f32.mrf.mxu0 }
 0x66c   :  { %v730_v15 = vmul.f32 -1.442695, %v525_v13 }
 0x66d   :  { %v527_v16 = vpop.f32.mrf.mxu0 }
 0x66e   :  { %928 = vpow2.f32 %v730_v15  ;;  %v528_v17 = vadd.f32 %v527_v16, %v441_v11 }
 0x66f   :  { %v835_v18 = vpop.f32.mrf.mxu0 }
 0x670   :  { %v731_v19 = vmul.f32 -1.442695, %v528_v17 }
 0x672   :  { %930 = vpow2.f32 %v731_v19 }
 0x67b   :  { %v929_v20 = vpop.eup %928 }
 0x67c   :  { %v537_v21 = vadd.f32 1.0, %v929_v20 }
 0x67e   :  { %932 = vrcp.f32 %v537_v21 }
 0x67f   :  { %v931_v22 = vpop.eup %930 }
 0x680   :  { %v538_v23 = vadd.f32 1.0, %v931_v22 }
 0x682   :  { %934 = vrcp.f32 %v538_v23 }
 0x68b   :  { %v933_v24 = vpop.eup %932 }
 0x68c   :  { %v543_v25 = vmul.f32 %v933_v24, %v525_v13 }
 0x68e   :  { %v545_v26 = vadd.f32 %v543_v25, %v1202_v39 }
 0x68f   :  { %v935_v27 = vpop.eup %934 }
 0x690   :  { %v544_v28 = vmul.f32 %v935_v27, %v528_v17  ;;  %547 = vadd.xlane.f32.xlu0 %v545_v26 }
 0x692   :  { %v546_v29 = vadd.f32 %v544_v28, %v1206_v42 }
 0x694   :  { %549 = vadd.xlane.f32.xlu1 %v546_v29 }
 0x719   :  { %v548_v32 = vpop.xlane.xlu0 %547 }
 0x71a   :  { %v551_v33 = vmul.f32 0.03125, %v548_v32 }
 0x71c   :  { %v553_v35 = vsub.f32 %v545_v26, %v551_v33 }
 0x71d   :  { %v550_v37 = vpop.xlane.xlu1 %549 }
 0x71e   :  { %v552_v38 = vmul.f32 0.03125, %v550_v37  ;;  %v555_v39 = vsel %vm106_vm0, %v553_v35, 0.0 }
 0x71f   :  { %v557_v40 = vmul.f32 %v555_v39, %v555_v39 }
 0x720   :  { %v554_v41 = vsub.f32 %v546_v29, %v552_v38 }
 0x721   :  { %559 = vadd.xlane.f32.xlu0 %v557_v40 }
 0x722   :  { %v556_v42 = vsel %vm106_vm0, %v554_v41, 0.0 }
 0x723   :  { %v558_v43 = vmul.f32 %v556_v42, %v556_v42 }
 0x725   :  { %561 = vadd.xlane.f32.xlu1 %v558_v43 }
 0x7aa   :  { %v560_v49 = vpop.xlane.xlu0 %559 }
 0x7ab   :  { %v563_v50 = vmul.f32 0.03125, %v560_v49 }
 0x7ad   :  { %v565_v51 = vadd.f32 1e-05, %v563_v50 }
 0x7ae   :  { %v562_v52 = vpop.xlane.xlu1 %561 }
 0x7af   :  { %v564_v53 = vmul.f32 0.03125, %v562_v52  ;;  %936 = vrsqrt.f32 %v565_v51 }
 0x7b1   :  { %v566_v54 = vadd.f32 1e-05, %v564_v53 }
 0x7b3   :  { %938 = vrsqrt.f32 %v566_v54 }
 0x7bc   :  { %v937_v55 = vpop.eup %936 }
 0x7bd   :  { %v569_v57 = vmul.f32 %v937_v55, %v555_v39 }
 0x7c0   :  { %v939_v56 = vpop.eup %938 }
 0x7c1   :  { %v570_v58 = vmul.f32 %v939_v56, %v556_v42 }
 0x7c3   :  { %v571_v59 = vpack.c.bf16 %v570_v58, %v569_v57 }
 0x7c5   :  { %853 = vmatmul.mubr.bf16.vlgmr.msra.gmra.mxu1 %v571_v59 }
 0x885   :  { %v674_v3 = vpop.f32.mrf.mxu1 }
 0x886   :  { %v675_v62 = vadd.f32 %v674_v3, %v591_v61 }
 0x887   :  { %v854_v63 = vpop.f32.mrf.mxu1 }
 0x888   :  { %681 = vst [vmem:[#allocation11] sm:$0xff] %v675_v62 }
 0x889   :  { %v677_v0 = vpop.f32.mrf.mxu1 }
 0x88a   :  { %v678_v1 = vadd.f32 %v677_v0, %v591_v61 }
 0x88b   :  { %v855_v2 = vpop.f32.mrf.mxu1 }
 0x88c   :  { %682 = vst [vmem:[#allocation11 + $0x8] sm:$0xff] %v678_v1 }
 0x88d   :  { %1051 = shalt.err (!%p1048_p1)
}
 0x88e   :  { %694 = dma.vmem_to_hbm [thread:$0]  %s689_s23, 256, %s1251_s6, [#allocation4], %s1073_s11, %s1073_s11, %s1074_s12  }
 0x88f   :  { %1066 = dma.done.wait [#allocation4], 256  }
 0x890   :  { %1067 = vsyncadd [#allocation4], 4294967040 }
 0x891   :  { %698 = vsyncpa [#allocation3], 1 }
 0x892   :  { %699 = vsyncpa [#allocation6], 1 }
 0x893   :  { %700 = vsyncpa [#allocation9], 1 }
 0x894   :  { %701 = vsyncpa [#allocation4], 1 }

</bundles_post_ra>
